<compile_context>
chip_gen: v6e
topology: v6e:2x2x1
jax: 0.10.0
libtpu: 0.0.40
codegen_flags: <defaults>
</compile_context>

<pallas_src>
import functools

import jax
import jax.numpy as jnp
from jax.experimental import pallas as pl
from jax.experimental.pallas import tpu as pltpu


def compensate_kernel(x_ref, wrow_ref, bias_ref, pmask_ref, addc_ref, o_ref,
                      *, time_chunk):
    """One (batch, time-tile) block.

    x_ref    : (1, D, NOTE, TT)  input tile (channels, note rows, time)
    wrow_ref : (D, NOTE, 1)      folded 1x1-conv weight per channel & row
    bias_ref : (NOTE, 1)         conv bias per row (0 on pass-through rows)
    pmask_ref: (D, NOTE, 1)      1.0 where the channel passes through unchanged
    addc_ref : (D, NOTE, 1)      `add` parameter per replaced channel (0 else)
    o_ref    : (1, D, NOTE, TT)
    """
    d_ch = x_ref.shape[1]
    tt = x_ref.shape[3]
    n_chunks = tt // time_chunk

    bias = bias_ref[...]  # (NOTE, 1), hoisted out of the chunk loop

    def process(t0):
        ts = pl.ds(t0, time_chunk)
        # Weight map = ReLU(sum_k w[k,r]*x[k,r,t] + b[r]).  Bias is folded into
        # the k=0 accumulator init (no separate broadcast slab).
        s = wrow_ref[0, :, :] * x_ref[0, 0, :, ts].astype(jnp.float32) + bias
        for k in range(1, d_ch):  # D is small (8); Python unroll is right here
            s = s + wrow_ref[k, :, :] * x_ref[0, k, :, ts].astype(jnp.float32)
        wm = jnp.maximum(s, 0.0)

        # Per-channel blend: pass-through XOR add*weight-map (mutually
        # exclusive), one select per element instead of two muls + add.
        for ch in range(d_ch):
            xc = x_ref[0, ch, :, ts].astype(jnp.float32)
            y = jnp.where(pmask_ref[ch, :, :] > 0.5, xc,
                          addc_ref[ch, :, :] * wm)
            o_ref[0, ch, :, ts] = y.astype(o_ref.dtype)

    if n_chunks == 1:
        process(0)
    else:
        def body(c, carry):
            process(pl.multiple_of(c * time_chunk, time_chunk))
            return carry
        jax.lax.fori_loop(0, n_chunks, body, 0, unroll=False)


def _vmem_limit_bytes():
    """3/4 of per-core VMEM (=> ~48 MiB v7x, 96 MiB v5e/v6e), conservative fallback."""
    cap = None
    try:
        cap = getattr(pltpu.get_tpu_info(), "vmem_capacity_bytes", None)
    except Exception:
        cap = None
    if not cap:
        cap = 64 * 1024 * 1024  # v7x per-TC capacity as the safe floor
    return min(int(cap * 3 // 4), 100 * 1024 * 1024)


def _pick_time_tile(d, note, t, itemsize, vmem_limit):
    """Largest lane-aligned time tile s.t. double-buffered in+out fit VMEM."""
    if t % 128 != 0:
        return t  # full-dim block is always legal
    per_time_bytes = d * note * itemsize          # bytes per time column per buffer
    budget = int(vmem_limit * 0.6) // 4           # 2x in + 2x out double buffers
    max_tt = max(128, (budget // max(per_time_bytes, 1)) // 128 * 128)
    cap_tt = max(128, ((8 << 20) // max(per_time_bytes, 1)) // 128 * 128)  # keep grid points
    tt = min(t, max_tt, cap_tt)
    while t % tt:                                  # shrink to a divisor of T
        tt -= 128
    return max(tt, 128)


def _pick_time_chunk(note, tt):
    """In-kernel sub-chunk so live slabs stay within the vreg file."""
    if tt % 128 != 0:
        return tt
    groups = -(-note // 8)                         # sublane groups per slab
    chunk = max(128, ((12 * 128) // groups) // 128 * 128)
    chunk = min(chunk, tt)
    while tt % chunk:
        chunk -= 128
    return max(chunk, 128)


@functools.partial(jax.jit, static_argnames=("offsets", "layers"))
def compensate_hs_forward(x, conv_w, conv_b, adds, *, offsets, layers):
    """CompensateHS forward.  x: (B, D, note, T) -> (B, D, note, T)."""
    B, D, note, T = x.shape
    assert sum(offsets) <= note, "note axis too short for the configured offsets"

    # ---- fold ragged per-band params into per-(channel, row) tables ----
    wrow = jnp.zeros((D, note), jnp.float32)   # 1x1-conv weights per row
    brow = jnp.zeros((note,), jnp.float32)     # conv bias per row
    pmask = jnp.zeros((D, note), jnp.float32)  # pass-through mask
    addc = jnp.zeros((D, note), jnp.float32)   # `add` coefficient per row
    row_hi = note
    for c, off, w_i, b_i, add_i in zip(layers, offsets, conv_w, conv_b, adds):
        r0, r1 = row_hi - off, row_hi
        din = D - c
        wrow = wrow.at[:din, r0:r1].set(w_i.reshape(din, 1).astype(jnp.float32))
        brow = brow.at[r0:r1].set(b_i.reshape(()).astype(jnp.float32))
        pmask = pmask.at[:din, r0:r1].set(1.0)
        addc = addc.at[din:, r0:r1].set(add_i.reshape(c, 1).astype(jnp.float32))
        row_hi -= off
    pmask = pmask.at[:, :row_hi].set(1.0)  # untouched bottom rows pass through

    wrow = wrow.reshape(D, note, 1)
    pmask = pmask.reshape(D, note, 1)
    addc = addc.reshape(D, note, 1)
    brow = brow.reshape(note, 1)

    vmem_limit = _vmem_limit_bytes()
    tt = _pick_time_tile(D, note, T, x.dtype.itemsize, vmem_limit)
    n_time_tiles = T // tt
    time_chunk = _pick_time_chunk(note, tt)

    flops = B * note * T * (4 * D + 1)
    bytes_accessed = (2 * x.size * x.dtype.itemsize
                      + (3 * D + 1) * note * 4)

    kernel = functools.partial(compensate_kernel, time_chunk=time_chunk)

    out = pl.pallas_call(
        kernel,
        out_shape=jax.ShapeDtypeStruct(x.shape, x.dtype),
        grid_spec=pltpu.PrefetchScalarGridSpec(
            num_scalar_prefetch=0,
            grid=(B, n_time_tiles),
            in_specs=[
                # x: big lane-dense blocks (full note axis, large time tile)
                pl.BlockSpec((1, D, note, tt), lambda b, t: (b, 0, 0, t)),
                # coefficient tables: VMEM-resident (constant index_map)
                pl.BlockSpec((D, note, 1), lambda b, t: (0, 0, 0)),
                pl.BlockSpec((note, 1), lambda b, t: (0, 0)),
                pl.BlockSpec((D, note, 1), lambda b, t: (0, 0, 0)),
                pl.BlockSpec((D, note, 1), lambda b, t: (0, 0, 0)),
            ],
            out_specs=pl.BlockSpec((1, D, note, tt), lambda b, t: (b, 0, 0, t)),
        ),
        compiler_params=pltpu.CompilerParams(
            dimension_semantics=("parallel", "parallel"),
            vmem_limit_bytes=vmem_limit),
        cost_estimate=pl.CostEstimate(
            flops=flops, transcendentals=0, bytes_accessed=bytes_accessed),
    )(x, wrow, brow, pmask, addc)
    return out


def compensate_hs_reference(x, conv_w, conv_b, adds, offsets, layers):
    """Pure-JAX mirror of the PyTorch forward (for verification)."""
    B, D, note, T = x.shape
    row_hi = note
    outs = []
    for c, off, w_i, b_i, add_i in zip(layers, offsets, conv_w, conv_b, adds):
        x_ = x[:, :D - c, row_hi - off:row_hi, :].astype(jnp.float32)
        wvec = w_i.reshape(1, D - c, 1, 1).astype(jnp.float32)
        weight = jnp.maximum(
            jnp.sum(x_ * wvec, axis=1, keepdims=True)
            + b_i.reshape(1, 1, 1, 1).astype(jnp.float32), 0.0)
        outs.append(jnp.concatenate(
            [x_, add_i.reshape(1, c, 1, 1).astype(jnp.float32) * weight],
            axis=1))
        row_hi -= off
    outs.append(x[:, :, :row_hi, :].astype(jnp.float32))
    outs = outs[::-1]
    return jnp.concatenate(outs, axis=2).astype(x.dtype)


if __name__ == "__main__":
    key = jax.random.PRNGKey(0)
    B, D, NOTE, T = 2, 8, 72, 128          # note >= sum(offsets)=65
    offsets = (21, 15, 12, 9, 8)
    layers = (5, 4, 3, 2, 1)

    n_br = len(layers)
    keys = jax.random.split(key, 1 + 3 * n_br)
    x = jax.random.normal(keys[0], (B, D, NOTE, T), dtype=jnp.float32)

    conv_w, conv_b, adds = [], [], []
    for i, c in enumerate(layers):
        kw, kb, ka = keys[1 + 3 * i], keys[2 + 3 * i], keys[3 + 3 * i]
        din = D - c
        # torch Conv2d(din, 1, 1, bias=True) weight layout: (1, din, 1, 1)
        conv_w.append(jax.random.normal(kw, (1, din, 1, 1), jnp.float32)
                      * (1.0 / din ** 0.5))
        conv_b.append(0.1 * jax.random.normal(kb, (1,), jnp.float32))
        # torch.rand(c, 1, 1)
        adds.append(jax.random.uniform(ka, (c, 1, 1), dtype=jnp.float32))
    conv_w, conv_b, adds = tuple(conv_w), tuple(conv_b), tuple(adds)

    out = compensate_hs_forward(x, conv_w, conv_b, adds,
                                offsets=offsets, layers=layers)
    out = jax.block_until_ready(out)

    ref = compensate_hs_reference(x, conv_w, conv_b, adds, offsets, layers)
    assert out.shape == (B, D, NOTE, T), out.shape
    max_err = float(jnp.max(jnp.abs(out - ref)))
    assert jnp.allclose(out, ref, atol=1e-4, rtol=1e-4), max_err

    print("KERNEL_OK")
</pallas_src>

<mosaic_0001>
module attributes {stable_mosaic.version = 11 : i64} {
  func.func @compensate_kernel(%arg0: i32, %arg1: i32, %arg2: memref<1x8x72x128xf32, #tpu.memory_space<vmem>>, %arg3: memref<8x72x1xf32, #tpu.memory_space<vmem>>, %arg4: memref<72x1xf32, #tpu.memory_space<vmem>>, %arg5: memref<8x72x1xf32, #tpu.memory_space<vmem>>, %arg6: memref<8x72x1xf32, #tpu.memory_space<vmem>>, %arg7: memref<1x8x72x128xf32, #tpu.memory_space<vmem>>) attributes {dimension_semantics = [#tpu.dimension_semantics<parallel>, #tpu.dimension_semantics<parallel>], iteration_bounds = array<i64: 2, 1>, scalar_prefetch = 0 : i64, scratch_operands = 0 : i64, tpu.core_type = #tpu.core_type<tc>, window_params = [{transform_indices = @transform_0, window_bounds = array<i64: 1, 8, 72, 128>}, {pipeline_mode = #tpu.pipeline_mode<synchronous>, transform_indices = @transform_1, window_bounds = array<i64: 8, 72, 1>}, {pipeline_mode = #tpu.pipeline_mode<synchronous>, transform_indices = @transform_2, window_bounds = array<i64: 72, 1>}, {pipeline_mode = #tpu.pipeline_mode<synchronous>, transform_indices = @transform_3, window_bounds = array<i64: 8, 72, 1>}, {pipeline_mode = #tpu.pipeline_mode<synchronous>, transform_indices = @transform_4, window_bounds = array<i64: 8, 72, 1>}, {transform_indices = @transform_5, window_bounds = array<i64: 1, 8, 72, 128>}]} {
    %c0 = arith.constant 0 : index
    %c0_0 = arith.constant 0 : index
    %0 = vector.load %arg4[%c0, %c0_0] : memref<72x1xf32, #tpu.memory_space<vmem>>, vector<72x1xf32>
    %c0_1 = arith.constant 0 : index
    %c0_2 = arith.constant 0 : index
    %c0_3 = arith.constant 0 : index
    %1 = vector.load %arg3[%c0_1, %c0_2, %c0_3] : memref<8x72x1xf32, #tpu.memory_space<vmem>>, vector<1x72x1xf32>
    %2 = vector.shape_cast %1 : vector<1x72x1xf32> to vector<72x1xf32>
    %c0_4 = arith.constant 0 : index
    %c0_5 = arith.constant 0 : index
    %c0_6 = arith.constant 0 : index
    %c0_7 = arith.constant 0 : index
    %3 = vector.load %arg2[%c0_4, %c0_5, %c0_6, %c0_7] : memref<1x8x72x128xf32, #tpu.memory_space<vmem>>, vector<1x1x72x128xf32>
    %4 = vector.shape_cast %3 : vector<1x1x72x128xf32> to vector<72x128xf32>
    %5 = vector.broadcast %2 : vector<72x1xf32> to vector<72x128xf32>
    %6 = arith.mulf %5, %4 : vector<72x128xf32>
    %7 = vector.broadcast %0 : vector<72x1xf32> to vector<72x128xf32>
    %8 = arith.addf %6, %7 : vector<72x128xf32>
    %c1 = arith.constant 1 : index
    %c0_8 = arith.constant 0 : index
    %c0_9 = arith.constant 0 : index
    %9 = vector.load %arg3[%c1, %c0_8, %c0_9] : memref<8x72x1xf32, #tpu.memory_space<vmem>>, vector<1x72x1xf32>
    %10 = vector.shape_cast %9 : vector<1x72x1xf32> to vector<72x1xf32>
    %c0_10 = arith.constant 0 : index
    %c1_11 = arith.constant 1 : index
    %c0_12 = arith.constant 0 : index
    %c0_13 = arith.constant 0 : index
    %11 = vector.load %arg2[%c0_10, %c1_11, %c0_12, %c0_13] : memref<1x8x72x128xf32, #tpu.memory_space<vmem>>, vector<1x1x72x128xf32>
    %12 = vector.shape_cast %11 : vector<1x1x72x128xf32> to vector<72x128xf32>
    %13 = vector.broadcast %10 : vector<72x1xf32> to vector<72x128xf32>
    %14 = arith.mulf %13, %12 : vector<72x128xf32>
    %15 = arith.addf %8, %14 : vector<72x128xf32>
    %c2 = arith.constant 2 : index
    %c0_14 = arith.constant 0 : index
    %c0_15 = arith.constant 0 : index
    %16 = vector.load %arg3[%c2, %c0_14, %c0_15] : memref<8x72x1xf32, #tpu.memory_space<vmem>>, vector<1x72x1xf32>
    %17 = vector.shape_cast %16 : vector<1x72x1xf32> to vector<72x1xf32>
    %c0_16 = arith.constant 0 : index
    %c2_17 = arith.constant 2 : index
    %c0_18 = arith.constant 0 : index
    %c0_19 = arith.constant 0 : index
    %18 = vector.load %arg2[%c0_16, %c2_17, %c0_18, %c0_19] : memref<1x8x72x128xf32, #tpu.memory_space<vmem>>, vector<1x1x72x128xf32>
    %19 = vector.shape_cast %18 : vector<1x1x72x128xf32> to vector<72x128xf32>
    %20 = vector.broadcast %17 : vector<72x1xf32> to vector<72x128xf32>
    %21 = arith.mulf %20, %19 : vector<72x128xf32>
    %22 = arith.addf %15, %21 : vector<72x128xf32>
    %c3 = arith.constant 3 : index
    %c0_20 = arith.constant 0 : index
    %c0_21 = arith.constant 0 : index
    %23 = vector.load %arg3[%c3, %c0_20, %c0_21] : memref<8x72x1xf32, #tpu.memory_space<vmem>>, vector<1x72x1xf32>
    %24 = vector.shape_cast %23 : vector<1x72x1xf32> to vector<72x1xf32>
    %c0_22 = arith.constant 0 : index
    %c3_23 = arith.constant 3 : index
    %c0_24 = arith.constant 0 : index
    %c0_25 = arith.constant 0 : index
    %25 = vector.load %arg2[%c0_22, %c3_23, %c0_24, %c0_25] : memref<1x8x72x128xf32, #tpu.memory_space<vmem>>, vector<1x1x72x128xf32>
    %26 = vector.shape_cast %25 : vector<1x1x72x128xf32> to vector<72x128xf32>
    %27 = vector.broadcast %24 : vector<72x1xf32> to vector<72x128xf32>
    %28 = arith.mulf %27, %26 : vector<72x128xf32>
    %29 = arith.addf %22, %28 : vector<72x128xf32>
    %c4 = arith.constant 4 : index
    %c0_26 = arith.constant 0 : index
    %c0_27 = arith.constant 0 : index
    %30 = vector.load %arg3[%c4, %c0_26, %c0_27] : memref<8x72x1xf32, #tpu.memory_space<vmem>>, vector<1x72x1xf32>
    %31 = vector.shape_cast %30 : vector<1x72x1xf32> to vector<72x1xf32>
    %c0_28 = arith.constant 0 : index
    %c4_29 = arith.constant 4 : index
    %c0_30 = arith.constant 0 : index
    %c0_31 = arith.constant 0 : index
    %32 = vector.load %arg2[%c0_28, %c4_29, %c0_30, %c0_31] : memref<1x8x72x128xf32, #tpu.memory_space<vmem>>, vector<1x1x72x128xf32>
    %33 = vector.shape_cast %32 : vector<1x1x72x128xf32> to vector<72x128xf32>
    %34 = vector.broadcast %31 : vector<72x1xf32> to vector<72x128xf32>
    %35 = arith.mulf %34, %33 : vector<72x128xf32>
    %36 = arith.addf %29, %35 : vector<72x128xf32>
    %c5 = arith.constant 5 : index
    %c0_32 = arith.constant 0 : index
    %c0_33 = arith.constant 0 : index
    %37 = vector.load %arg3[%c5, %c0_32, %c0_33] : memref<8x72x1xf32, #tpu.memory_space<vmem>>, vector<1x72x1xf32>
    %38 = vector.shape_cast %37 : vector<1x72x1xf32> to vector<72x1xf32>
    %c0_34 = arith.constant 0 : index
    %c5_35 = arith.constant 5 : index
    %c0_36 = arith.constant 0 : index
    %c0_37 = arith.constant 0 : index
    %39 = vector.load %arg2[%c0_34, %c5_35, %c0_36, %c0_37] : memref<1x8x72x128xf32, #tpu.memory_space<vmem>>, vector<1x1x72x128xf32>
    %40 = vector.shape_cast %39 : vector<1x1x72x128xf32> to vector<72x128xf32>
    %41 = vector.broadcast %38 : vector<72x1xf32> to vector<72x128xf32>
    %42 = arith.mulf %41, %40 : vector<72x128xf32>
    %43 = arith.addf %36, %42 : vector<72x128xf32>
    %c6 = arith.constant 6 : index
    %c0_38 = arith.constant 0 : index
    %c0_39 = arith.constant 0 : index
    %44 = vector.load %arg3[%c6, %c0_38, %c0_39] : memref<8x72x1xf32, #tpu.memory_space<vmem>>, vector<1x72x1xf32>
    %45 = vector.shape_cast %44 : vector<1x72x1xf32> to vector<72x1xf32>
    %c0_40 = arith.constant 0 : index
    %c6_41 = arith.constant 6 : index
    %c0_42 = arith.constant 0 : index
    %c0_43 = arith.constant 0 : index
    %46 = vector.load %arg2[%c0_40, %c6_41, %c0_42, %c0_43] : memref<1x8x72x128xf32, #tpu.memory_space<vmem>>, vector<1x1x72x128xf32>
    %47 = vector.shape_cast %46 : vector<1x1x72x128xf32> to vector<72x128xf32>
    %48 = vector.broadcast %45 : vector<72x1xf32> to vector<72x128xf32>
    %49 = arith.mulf %48, %47 : vector<72x128xf32>
    %50 = arith.addf %43, %49 : vector<72x128xf32>
    %c7 = arith.constant 7 : index
    %c0_44 = arith.constant 0 : index
    %c0_45 = arith.constant 0 : index
    %51 = vector.load %arg3[%c7, %c0_44, %c0_45] : memref<8x72x1xf32, #tpu.memory_space<vmem>>, vector<1x72x1xf32>
    %52 = vector.shape_cast %51 : vector<1x72x1xf32> to vector<72x1xf32>
    %c0_46 = arith.constant 0 : index
    %c7_47 = arith.constant 7 : index
    %c0_48 = arith.constant 0 : index
    %c0_49 = arith.constant 0 : index
    %53 = vector.load %arg2[%c0_46, %c7_47, %c0_48, %c0_49] : memref<1x8x72x128xf32, #tpu.memory_space<vmem>>, vector<1x1x72x128xf32>
    %54 = vector.shape_cast %53 : vector<1x1x72x128xf32> to vector<72x128xf32>
    %55 = vector.broadcast %52 : vector<72x1xf32> to vector<72x128xf32>
    %56 = arith.mulf %55, %54 : vector<72x128xf32>
    %57 = arith.addf %50, %56 : vector<72x128xf32>
    %cst = arith.constant 0.000000e+00 : f32
    %58 = vector.broadcast %cst : f32 to vector<72x128xf32>
    %59 = arith.maximumf %57, %58 : vector<72x128xf32>
    %c0_50 = arith.constant 0 : index
    %c0_51 = arith.constant 0 : index
    %c0_52 = arith.constant 0 : index
    %c0_53 = arith.constant 0 : index
    %60 = vector.load %arg2[%c0_50, %c0_51, %c0_52, %c0_53] : memref<1x8x72x128xf32, #tpu.memory_space<vmem>>, vector<1x1x72x128xf32>
    %61 = vector.shape_cast %60 : vector<1x1x72x128xf32> to vector<72x128xf32>
    %c0_54 = arith.constant 0 : index
    %c0_55 = arith.constant 0 : index
    %c0_56 = arith.constant 0 : index
    %62 = vector.load %arg5[%c0_54, %c0_55, %c0_56] : memref<8x72x1xf32, #tpu.memory_space<vmem>>, vector<1x72x1xf32>
    %63 = vector.shape_cast %62 : vector<1x72x1xf32> to vector<72x1xf32>
    %cst_57 = arith.constant 5.000000e-01 : f32
    %64 = vector.broadcast %cst_57 : f32 to vector<72x1xf32>
    %65 = arith.cmpf ogt, %63, %64 : vector<72x1xf32>
    %c0_58 = arith.constant 0 : index
    %c0_59 = arith.constant 0 : index
    %c0_60 = arith.constant 0 : index
    %66 = vector.load %arg6[%c0_58, %c0_59, %c0_60] : memref<8x72x1xf32, #tpu.memory_space<vmem>>, vector<1x72x1xf32>
    %67 = vector.shape_cast %66 : vector<1x72x1xf32> to vector<72x1xf32>
    %68 = vector.broadcast %67 : vector<72x1xf32> to vector<72x128xf32>
    %69 = arith.mulf %68, %59 : vector<72x128xf32>
    %70 = vector.shape_cast %65 : vector<72x1xi1> to vector<72x1xi1>
    %71 = vector.broadcast %70 : vector<72x1xi1> to vector<72x128xi1>
    %72 = arith.select %71, %61, %69 : vector<72x128xi1>, vector<72x128xf32>
    %c0_61 = arith.constant 0 : index
    %c0_62 = arith.constant 0 : index
    %c0_63 = arith.constant 0 : index
    %c0_64 = arith.constant 0 : index
    %73 = vector.load %arg7[%c0_61, %c0_62, %c0_63, %c0_64] : memref<1x8x72x128xf32, #tpu.memory_space<vmem>>, vector<1x1x72x128xf32>
    %74 = vector.shape_cast %73 : vector<1x1x72x128xf32> to vector<72x128xf32>
    %75 = vector.shape_cast %72 : vector<72x128xf32> to vector<1x1x72x128xf32>
    tpu.vector_store %arg7[%c0_61, %c0_62, %c0_63, %c0_64], %75 {strides = array<i32>} : memref<1x8x72x128xf32, #tpu.memory_space<vmem>>, vector<1x1x72x128xf32>,
    %c0_65 = arith.constant 0 : index
    %c1_66 = arith.constant 1 : index
    %c0_67 = arith.constant 0 : index
    %c0_68 = arith.constant 0 : index
    %76 = vector.load %arg2[%c0_65, %c1_66, %c0_67, %c0_68] : memref<1x8x72x128xf32, #tpu.memory_space<vmem>>, vector<1x1x72x128xf32>
    %77 = vector.shape_cast %76 : vector<1x1x72x128xf32> to vector<72x128xf32>
    %c1_69 = arith.constant 1 : index
    %c0_70 = arith.constant 0 : index
    %c0_71 = arith.constant 0 : index
    %78 = vector.load %arg5[%c1_69, %c0_70, %c0_71] : memref<8x72x1xf32, #tpu.memory_space<vmem>>, vector<1x72x1xf32>
    %79 = vector.shape_cast %78 : vector<1x72x1xf32> to vector<72x1xf32>
    %cst_72 = arith.constant 5.000000e-01 : f32
    %80 = vector.broadcast %cst_72 : f32 to vector<72x1xf32>
    %81 = arith.cmpf ogt, %79, %80 : vector<72x1xf32>
    %c1_73 = arith.constant 1 : index
    %c0_74 = arith.constant 0 : index
    %c0_75 = arith.constant 0 : index
    %82 = vector.load %arg6[%c1_73, %c0_74, %c0_75] : memref<8x72x1xf32, #tpu.memory_space<vmem>>, vector<1x72x1xf32>
    %83 = vector.shape_cast %82 : vector<1x72x1xf32> to vector<72x1xf32>
    %84 = vector.broadcast %83 : vector<72x1xf32> to vector<72x128xf32>
    %85 = arith.mulf %84, %59 : vector<72x128xf32>
    %86 = vector.shape_cast %81 : vector<72x1xi1> to vector<72x1xi1>
    %87 = vector.broadcast %86 : vector<72x1xi1> to vector<72x128xi1>
    %88 = arith.select %87, %77, %85 : vector<72x128xi1>, vector<72x128xf32>
    %c0_76 = arith.constant 0 : index
    %c1_77 = arith.constant 1 : index
    %c0_78 = arith.constant 0 : index
    %c0_79 = arith.constant 0 : index
    %89 = vector.load %arg7[%c0_76, %c1_77, %c0_78, %c0_79] : memref<1x8x72x128xf32, #tpu.memory_space<vmem>>, vector<1x1x72x128xf32>
    %90 = vector.shape_cast %89 : vector<1x1x72x128xf32> to vector<72x128xf32>
    %91 = vector.shape_cast %88 : vector<72x128xf32> to vector<1x1x72x128xf32>
    tpu.vector_store %arg7[%c0_76, %c1_77, %c0_78, %c0_79], %91 {strides = array<i32>} : memref<1x8x72x128xf32, #tpu.memory_space<vmem>>, vector<1x1x72x128xf32>,
    %c0_80 = arith.constant 0 : index
    %c2_81 = arith.constant 2 : index
    %c0_82 = arith.constant 0 : index
    %c0_83 = arith.constant 0 : index
    %92 = vector.load %arg2[%c0_80, %c2_81, %c0_82, %c0_83] : memref<1x8x72x128xf32, #tpu.memory_space<vmem>>, vector<1x1x72x128xf32>
    %93 = vector.shape_cast %92 : vector<1x1x72x128xf32> to vector<72x128xf32>
    %c2_84 = arith.constant 2 : index
    %c0_85 = arith.constant 0 : index
    %c0_86 = arith.constant 0 : index
    %94 = vector.load %arg5[%c2_84, %c0_85, %c0_86] : memref<8x72x1xf32, #tpu.memory_space<vmem>>, vector<1x72x1xf32>
    %95 = vector.shape_cast %94 : vector<1x72x1xf32> to vector<72x1xf32>
    %cst_87 = arith.constant 5.000000e-01 : f32
    %96 = vector.broadcast %cst_87 : f32 to vector<72x1xf32>
    %97 = arith.cmpf ogt, %95, %96 : vector<72x1xf32>
    %c2_88 = arith.constant 2 : index
    %c0_89 = arith.constant 0 : index
    %c0_90 = arith.constant 0 : index
    %98 = vector.load %arg6[%c2_88, %c0_89, %c0_90] : memref<8x72x1xf32, #tpu.memory_space<vmem>>, vector<1x72x1xf32>
    %99 = vector.shape_cast %98 : vector<1x72x1xf32> to vector<72x1xf32>
    %100 = vector.broadcast %99 : vector<72x1xf32> to vector<72x128xf32>
    %101 = arith.mulf %100, %59 : vector<72x128xf32>
    %102 = vector.shape_cast %97 : vector<72x1xi1> to vector<72x1xi1>
    %103 = vector.broadcast %102 : vector<72x1xi1> to vector<72x128xi1>
    %104 = arith.select %103, %93, %101 : vector<72x128xi1>, vector<72x128xf32>
    %c0_91 = arith.constant 0 : index
    %c2_92 = arith.constant 2 : index
    %c0_93 = arith.constant 0 : index
    %c0_94 = arith.constant 0 : index
    %105 = vector.load %arg7[%c0_91, %c2_92, %c0_93, %c0_94] : memref<1x8x72x128xf32, #tpu.memory_space<vmem>>, vector<1x1x72x128xf32>
    %106 = vector.shape_cast %105 : vector<1x1x72x128xf32> to vector<72x128xf32>
    %107 = vector.shape_cast %104 : vector<72x128xf32> to vector<1x1x72x128xf32>
    tpu.vector_store %arg7[%c0_91, %c2_92, %c0_93, %c0_94], %107 {strides = array<i32>} : memref<1x8x72x128xf32, #tpu.memory_space<vmem>>, vector<1x1x72x128xf32>,
    %c0_95 = arith.constant 0 : index
    %c3_96 = arith.constant 3 : index
    %c0_97 = arith.constant 0 : index
    %c0_98 = arith.constant 0 : index
    %108 = vector.load %arg2[%c0_95, %c3_96, %c0_97, %c0_98] : memref<1x8x72x128xf32, #tpu.memory_space<vmem>>, vector<1x1x72x128xf32>
    %109 = vector.shape_cast %108 : vector<1x1x72x128xf32> to vector<72x128xf32>
    %c3_99 = arith.constant 3 : index
    %c0_100 = arith.constant 0 : index
    %c0_101 = arith.constant 0 : index
    %110 = vector.load %arg5[%c3_99, %c0_100, %c0_101] : memref<8x72x1xf32, #tpu.memory_space<vmem>>, vector<1x72x1xf32>
    %111 = vector.shape_cast %110 : vector<1x72x1xf32> to vector<72x1xf32>
    %cst_102 = arith.constant 5.000000e-01 : f32
    %112 = vector.broadcast %cst_102 : f32 to vector<72x1xf32>
    %113 = arith.cmpf ogt, %111, %112 : vector<72x1xf32>
    %c3_103 = arith.constant 3 : index
    %c0_104 = arith.constant 0 : index
    %c0_105 = arith.constant 0 : index
    %114 = vector.load %arg6[%c3_103, %c0_104, %c0_105] : memref<8x72x1xf32, #tpu.memory_space<vmem>>, vector<1x72x1xf32>
    %115 = vector.shape_cast %114 : vector<1x72x1xf32> to vector<72x1xf32>
    %116 = vector.broadcast %115 : vector<72x1xf32> to vector<72x128xf32>
    %117 = arith.mulf %116, %59 : vector<72x128xf32>
    %118 = vector.shape_cast %113 : vector<72x1xi1> to vector<72x1xi1>
    %119 = vector.broadcast %118 : vector<72x1xi1> to vector<72x128xi1>
    %120 = arith.select %119, %109, %117 : vector<72x128xi1>, vector<72x128xf32>
    %c0_106 = arith.constant 0 : index
    %c3_107 = arith.constant 3 : index
    %c0_108 = arith.constant 0 : index
    %c0_109 = arith.constant 0 : index
    %121 = vector.load %arg7[%c0_106, %c3_107, %c0_108, %c0_109] : memref<1x8x72x128xf32, #tpu.memory_space<vmem>>, vector<1x1x72x128xf32>
    %122 = vector.shape_cast %121 : vector<1x1x72x128xf32> to vector<72x128xf32>
    %123 = vector.shape_cast %120 : vector<72x128xf32> to vector<1x1x72x128xf32>
    tpu.vector_store %arg7[%c0_106, %c3_107, %c0_108, %c0_109], %123 {strides = array<i32>} : memref<1x8x72x128xf32, #tpu.memory_space<vmem>>, vector<1x1x72x128xf32>,
    %c0_110 = arith.constant 0 : index
    %c4_111 = arith.constant 4 : index
    %c0_112 = arith.constant 0 : index
    %c0_113 = arith.constant 0 : index
    %124 = vector.load %arg2[%c0_110, %c4_111, %c0_112, %c0_113] : memref<1x8x72x128xf32, #tpu.memory_space<vmem>>, vector<1x1x72x128xf32>
    %125 = vector.shape_cast %124 : vector<1x1x72x128xf32> to vector<72x128xf32>
    %c4_114 = arith.constant 4 : index
    %c0_115 = arith.constant 0 : index
    %c0_116 = arith.constant 0 : index
    %126 = vector.load %arg5[%c4_114, %c0_115, %c0_116] : memref<8x72x1xf32, #tpu.memory_space<vmem>>, vector<1x72x1xf32>
    %127 = vector.shape_cast %126 : vector<1x72x1xf32> to vector<72x1xf32>
    %cst_117 = arith.constant 5.000000e-01 : f32
    %128 = vector.broadcast %cst_117 : f32 to vector<72x1xf32>
    %129 = arith.cmpf ogt, %127, %128 : vector<72x1xf32>
    %c4_118 = arith.constant 4 : index
    %c0_119 = arith.constant 0 : index
    %c0_120 = arith.constant 0 : index
    %130 = vector.load %arg6[%c4_118, %c0_119, %c0_120] : memref<8x72x1xf32, #tpu.memory_space<vmem>>, vector<1x72x1xf32>
    %131 = vector.shape_cast %130 : vector<1x72x1xf32> to vector<72x1xf32>
    %132 = vector.broadcast %131 : vector<72x1xf32> to vector<72x128xf32>
    %133 = arith.mulf %132, %59 : vector<72x128xf32>
    %134 = vector.shape_cast %129 : vector<72x1xi1> to vector<72x1xi1>
    %135 = vector.broadcast %134 : vector<72x1xi1> to vector<72x128xi1>
    %136 = arith.select %135, %125, %133 : vector<72x128xi1>, vector<72x128xf32>
    %c0_121 = arith.constant 0 : index
    %c4_122 = arith.constant 4 : index
    %c0_123 = arith.constant 0 : index
    %c0_124 = arith.constant 0 : index
    %137 = vector.load %arg7[%c0_121, %c4_122, %c0_123, %c0_124] : memref<1x8x72x128xf32, #tpu.memory_space<vmem>>, vector<1x1x72x128xf32>
    %138 = vector.shape_cast %137 : vector<1x1x72x128xf32> to vector<72x128xf32>
    %139 = vector.shape_cast %136 : vector<72x128xf32> to vector<1x1x72x128xf32>
    tpu.vector_store %arg7[%c0_121, %c4_122, %c0_123, %c0_124], %139 {strides = array<i32>} : memref<1x8x72x128xf32, #tpu.memory_space<vmem>>, vector<1x1x72x128xf32>,
    %c0_125 = arith.constant 0 : index
    %c5_126 = arith.constant 5 : index
    %c0_127 = arith.constant 0 : index
    %c0_128 = arith.constant 0 : index
    %140 = vector.load %arg2[%c0_125, %c5_126, %c0_127, %c0_128] : memref<1x8x72x128xf32, #tpu.memory_space<vmem>>, vector<1x1x72x128xf32>
    %141 = vector.shape_cast %140 : vector<1x1x72x128xf32> to vector<72x128xf32>
    %c5_129 = arith.constant 5 : index
    %c0_130 = arith.constant 0 : index
    %c0_131 = arith.constant 0 : index
    %142 = vector.load %arg5[%c5_129, %c0_130, %c0_131] : memref<8x72x1xf32, #tpu.memory_space<vmem>>, vector<1x72x1xf32>
    %143 = vector.shape_cast %142 : vector<1x72x1xf32> to vector<72x1xf32>
    %cst_132 = arith.constant 5.000000e-01 : f32
    %144 = vector.broadcast %cst_132 : f32 to vector<72x1xf32>
    %145 = arith.cmpf ogt, %143, %144 : vector<72x1xf32>
    %c5_133 = arith.constant 5 : index
    %c0_134 = arith.constant 0 : index
    %c0_135 = arith.constant 0 : index
    %146 = vector.load %arg6[%c5_133, %c0_134, %c0_135] : memref<8x72x1xf32, #tpu.memory_space<vmem>>, vector<1x72x1xf32>
    %147 = vector.shape_cast %146 : vector<1x72x1xf32> to vector<72x1xf32>
    %148 = vector.broadcast %147 : vector<72x1xf32> to vector<72x128xf32>
    %149 = arith.mulf %148, %59 : vector<72x128xf32>
    %150 = vector.shape_cast %145 : vector<72x1xi1> to vector<72x1xi1>
    %151 = vector.broadcast %150 : vector<72x1xi1> to vector<72x128xi1>
    %152 = arith.select %151, %141, %149 : vector<72x128xi1>, vector<72x128xf32>
    %c0_136 = arith.constant 0 : index
    %c5_137 = arith.constant 5 : index
    %c0_138 = arith.constant 0 : index
    %c0_139 = arith.constant 0 : index
    %153 = vector.load %arg7[%c0_136, %c5_137, %c0_138, %c0_139] : memref<1x8x72x128xf32, #tpu.memory_space<vmem>>, vector<1x1x72x128xf32>
    %154 = vector.shape_cast %153 : vector<1x1x72x128xf32> to vector<72x128xf32>
    %155 = vector.shape_cast %152 : vector<72x128xf32> to vector<1x1x72x128xf32>
    tpu.vector_store %arg7[%c0_136, %c5_137, %c0_138, %c0_139], %155 {strides = array<i32>} : memref<1x8x72x128xf32, #tpu.memory_space<vmem>>, vector<1x1x72x128xf32>,
    %c0_140 = arith.constant 0 : index
    %c6_141 = arith.constant 6 : index
    %c0_142 = arith.constant 0 : index
    %c0_143 = arith.constant 0 : index
    %156 = vector.load %arg2[%c0_140, %c6_141, %c0_142, %c0_143] : memref<1x8x72x128xf32, #tpu.memory_space<vmem>>, vector<1x1x72x128xf32>
    %157 = vector.shape_cast %156 : vector<1x1x72x128xf32> to vector<72x128xf32>
    %c6_144 = arith.constant 6 : index
    %c0_145 = arith.constant 0 : index
    %c0_146 = arith.constant 0 : index
    %158 = vector.load %arg5[%c6_144, %c0_145, %c0_146] : memref<8x72x1xf32, #tpu.memory_space<vmem>>, vector<1x72x1xf32>
    %159 = vector.shape_cast %158 : vector<1x72x1xf32> to vector<72x1xf32>
    %cst_147 = arith.constant 5.000000e-01 : f32
    %160 = vector.broadcast %cst_147 : f32 to vector<72x1xf32>
    %161 = arith.cmpf ogt, %159, %160 : vector<72x1xf32>
    %c6_148 = arith.constant 6 : index
    %c0_149 = arith.constant 0 : index
    %c0_150 = arith.constant 0 : index
    %162 = vector.load %arg6[%c6_148, %c0_149, %c0_150] : memref<8x72x1xf32, #tpu.memory_space<vmem>>, vector<1x72x1xf32>
    %163 = vector.shape_cast %162 : vector<1x72x1xf32> to vector<72x1xf32>
    %164 = vector.broadcast %163 : vector<72x1xf32> to vector<72x128xf32>
    %165 = arith.mulf %164, %59 : vector<72x128xf32>
    %166 = vector.shape_cast %161 : vector<72x1xi1> to vector<72x1xi1>
    %167 = vector.broadcast %166 : vector<72x1xi1> to vector<72x128xi1>
    %168 = arith.select %167, %157, %165 : vector<72x128xi1>, vector<72x128xf32>
    %c0_151 = arith.constant 0 : index
    %c6_152 = arith.constant 6 : index
    %c0_153 = arith.constant 0 : index
    %c0_154 = arith.constant 0 : index
    %169 = vector.load %arg7[%c0_151, %c6_152, %c0_153, %c0_154] : memref<1x8x72x128xf32, #tpu.memory_space<vmem>>, vector<1x1x72x128xf32>
    %170 = vector.shape_cast %169 : vector<1x1x72x128xf32> to vector<72x128xf32>
    %171 = vector.shape_cast %168 : vector<72x128xf32> to vector<1x1x72x128xf32>
    tpu.vector_store %arg7[%c0_151, %c6_152, %c0_153, %c0_154], %171 {strides = array<i32>} : memref<1x8x72x128xf32, #tpu.memory_space<vmem>>, vector<1x1x72x128xf32>,
    %c0_155 = arith.constant 0 : index
    %c7_156 = arith.constant 7 : index
    %c0_157 = arith.constant 0 : index
    %c0_158 = arith.constant 0 : index
    %172 = vector.load %arg2[%c0_155, %c7_156, %c0_157, %c0_158] : memref<1x8x72x128xf32, #tpu.memory_space<vmem>>, vector<1x1x72x128xf32>
    %173 = vector.shape_cast %172 : vector<1x1x72x128xf32> to vector<72x128xf32>
    %c7_159 = arith.constant 7 : index
    %c0_160 = arith.constant 0 : index
    %c0_161 = arith.constant 0 : index
    %174 = vector.load %arg5[%c7_159, %c0_160, %c0_161] : memref<8x72x1xf32, #tpu.memory_space<vmem>>, vector<1x72x1xf32>
    %175 = vector.shape_cast %174 : vector<1x72x1xf32> to vector<72x1xf32>
    %cst_162 = arith.constant 5.000000e-01 : f32
    %176 = vector.broadcast %cst_162 : f32 to vector<72x1xf32>
    %177 = arith.cmpf ogt, %175, %176 : vector<72x1xf32>
    %c7_163 = arith.constant 7 : index
    %c0_164 = arith.constant 0 : index
    %c0_165 = arith.constant 0 : index
    %178 = vector.load %arg6[%c7_163, %c0_164, %c0_165] : memref<8x72x1xf32, #tpu.memory_space<vmem>>, vector<1x72x1xf32>
    %179 = vector.shape_cast %178 : vector<1x72x1xf32> to vector<72x1xf32>
    %180 = vector.broadcast %179 : vector<72x1xf32> to vector<72x128xf32>
    %181 = arith.mulf %180, %59 : vector<72x128xf32>
    %182 = vector.shape_cast %177 : vector<72x1xi1> to vector<72x1xi1>
    %183 = vector.broadcast %182 : vector<72x1xi1> to vector<72x128xi1>
    %184 = arith.select %183, %173, %181 : vector<72x128xi1>, vector<72x128xf32>
    %c0_166 = arith.constant 0 : index
    %c7_167 = arith.constant 7 : index
    %c0_168 = arith.constant 0 : index
    %c0_169 = arith.constant 0 : index
    %185 = vector.load %arg7[%c0_166, %c7_167, %c0_168, %c0_169] : memref<1x8x72x128xf32, #tpu.memory_space<vmem>>, vector<1x1x72x128xf32>
    %186 = vector.shape_cast %185 : vector<1x1x72x128xf32> to vector<72x128xf32>
    %187 = vector.shape_cast %184 : vector<72x128xf32> to vector<1x1x72x128xf32>
    tpu.vector_store %arg7[%c0_166, %c7_167, %c0_168, %c0_169], %187 {strides = array<i32>} : memref<1x8x72x128xf32, #tpu.memory_space<vmem>>, vector<1x1x72x128xf32>,
    return
  }
  func.func @transform_0(%arg0: i32, %arg1: i32) -> (i32, i32, i32, i32) {
    %c0_i32 = arith.constant 0 : i32
    %c0_i32_0 = arith.constant 0 : i32
    %c0_i32_1 = arith.constant 0 : i32
    return %arg0, %c0_i32, %c0_i32_0, %arg1 : i32, i32, i32, i32
  }
  func.func @transform_1(%arg0: i32, %arg1: i32) -> (i32, i32, i32) {
    %c0_i32 = arith.constant 0 : i32
    %c0_i32_0 = arith.constant 0 : i32
    %c0_i32_1 = arith.constant 0 : i32
    %c0_i32_2 = arith.constant 0 : i32
    return %c0_i32, %c0_i32_0, %c0_i32_1 : i32, i32, i32
  }
  func.func @transform_2(%arg0: i32, %arg1: i32) -> (i32, i32) {
    %c0_i32 = arith.constant 0 : i32
    %c0_i32_0 = arith.constant 0 : i32
    %c0_i32_1 = arith.constant 0 : i32
    return %c0_i32, %c0_i32_0 : i32, i32
  }
  func.func @transform_3(%arg0: i32, %arg1: i32) -> (i32, i32, i32) {
    %c0_i32 = arith.constant 0 : i32
    %c0_i32_0 = arith.constant 0 : i32
    %c0_i32_1 = arith.constant 0 : i32
    %c0_i32_2 = arith.constant 0 : i32
    return %c0_i32, %c0_i32_0, %c0_i32_1 : i32, i32, i32
  }
  func.func @transform_4(%arg0: i32, %arg1: i32) -> (i32, i32, i32) {
    %c0_i32 = arith.constant 0 : i32
    %c0_i32_0 = arith.constant 0 : i32
    %c0_i32_1 = arith.constant 0 : i32
    %c0_i32_2 = arith.constant 0 : i32
    return %c0_i32, %c0_i32_0, %c0_i32_1 : i32, i32, i32
  }
  func.func @transform_5(%arg0: i32, %arg1: i32) -> (i32, i32, i32, i32) {
    %c0_i32 = arith.constant 0 : i32
    %c0_i32_0 = arith.constant 0 : i32
    %c0_i32_1 = arith.constant 0 : i32
    return %arg0, %c0_i32, %c0_i32_0, %arg1 : i32, i32, i32, i32
  }
}

</mosaic_0001>

<bundles_post_ra>
// kernel: compensate_hs_forward.1
= control target key start
LH: loop header
LB: loop body
LE: loop exit
PB: predicated region body
PF: predicated region fallthrough
CT: control target
= control target key end

     0   :  { %10 = vsyncpa [#allocation3], 0  ;;  %s4404_s0 = inlined_call_operand.vmem [shape: f32[2,8,72,128], index: 0, kind: input, shape index: {}]   ;;  %s4405_s1 = inlined_call_operand.vmem [shape: f32[8,72,1], index: 1, kind: input, shape index: {}]   ;;  %s4406_s2 = inlined_call_operand.vmem [shape: f32[72,1], index: 2, kind: input, shape index: {}]   ;;  %s4407_s3 = inlined_call_operand.vmem [shape: f32[8,72,1], index: 3, kind: input, shape index: {}]   ;;  %s4408_s4 = inlined_call_operand.vmem [shape: f32[8,72,1], index: 4, kind: input, shape index: {}]   ;;  %s4409_s5 = inlined_call_operand.hbm [shape: f32[2,8,72,128], index: 5, kind: output, shape index: {}]  }
   0x1   :  { %12 = vsyncpa [#allocation3 + $0x1], 0  ;;  %s2864_s18 = smov 0   ;;  %s2866_s19 = smov 0  }
   0x2   :  { %s2868_s20 = smov 0   ;;  %s2870_s21 = smov 0  }
   0x3   :  { %s2872_s22 = smov 0   ;;  %s2874_s23 = smov 0  }
   0x4 LB: > { %s2302_s24 = sadd.s32 4294967295, %s2828_s23   ;;  %s2303_s25 = sadd.s32 4294967294, %s2828_s23   ;;  %s2828_s23 = sphi %s2874_s23, %s18_s23   ;;  %s2824_s22 = sphi %s2872_s22, %s4502_s22   ;;  %s2820_s21 = sphi %s2870_s21, %s4501_s21   ;;  %s2816_s20 = sphi %s2868_s20, %s4500_s20   ;;  %s2812_s19 = sphi %s2866_s19, %s4499_s19   ;;  %s2808_s18 = sphi %s2864_s18, %s4498_s18  }
   0x5   : > { %s30_s26 = sadd.s32 1, %s2824_s22  ;;  %s151_s27 = sadd.s32 1, %s2816_s20 }
   0x6   : > { %p32_p0 = scmp.ge.s32.totalorder %s30_s26, 2  ;;  %p161_p1 = scmp.ne.s32.totalorder %s2816_s20, %s2812_s19 }
   0x7   : > { %p162_p2 = scmp.eq.s32.totalorder %s2302_s24, 1  ;;  %p167_p3 = scmp.ne.s32.totalorder %s2812_s19, %s2808_s18 }
   0x8   : > { %s4504_s26 = smov (%p32_p0, %s30_s26), 0  ;;  %p168_p5 = scmp.eq.s32.totalorder %s2303_s25, 1 }
   0x9   : > { %p2904_p4 = por %p162_p2, %p161_p1  ;;  %s146_s29 = ssub.s32 %s2824_s22, %s4504_s26 }
   0xa   : > { %p2306_p6 = scmp.ge.s32.totalorder %s2828_s23, 1  ;;  %p149_p7 = scmp.eq.s32.totalorder %s146_s29, 0 }
   0xb   : > { %p2911_p8 = por %p168_p5, %p167_p3  ;;  %p209_p9 = scmp.lt.s32.totalorder %s2828_s23, 3 }
   0xc   : > { %s2917_s6 = scalar_select %p149_p7, %s2816_s20, %s151_s27  }
   0xd   : > { %p210_p10 = pnand %p2306_p6, %p209_p9 }
   0xf   : > { %213 = sbr.rel (%p210_p10) target bundleno = 610 (0x262), region = 40 }
  0x14   : > { %v259_v0 = vld [vmem:[%s4405_s1 + $0x10] sm:$0xff]  ;;  %v257_v1 = vld [vmem:[%s4405_s1] sm:$0xff]  ;;  %v4410_v2 = vmov 0   ;;  %v260_v3 = vld [vmem:[%s4405_s1 + $0x18] sm:$0xff]  ;;  %p240_p11 = scmp.lt.s32.totalorder %s2820_s21, 1  ;;  %s237_s27 = sand.u32 1, %s2812_s19  }
  0x15   : > { %2751 = vset.pattern.permute.xlu1 %v4410_v2  ;;  %2750 = vset.pattern.permute.xlu0 %v4410_v2  ;;  %v258_v4 = vld [vmem:[%s4405_s1 + $0x8] sm:$0xff]  ;;  %v261_v6 = vld [vmem:[%s4405_s1 + $0x20] sm:$0xff]  ;;  %v264_v7 = vld [vmem:[%s4405_s1 + $0x38] sm:$0xff]  ;;  %s3815_s29 = smul.u32 576, %s237_s27  ;;  %s2831_s13 = smov [#allocation2]  }
  0x16   : > { %287 = vperm.xlu1 %2751, %v259_v0   ;;  %277 = vperm.xlu0 %2750, %v257_v1   ;;  %v262_v5 = vld [vmem:[%s4405_s1 + $0x28] sm:$0xff]  ;;  %v263_v8 = vld [vmem:[%s4405_s1 + $0x30] sm:$0xff]  ;;  %v265_v9 = vld [vmem:[%s4405_s1 + $0x40] sm:$0xff]  ;;  %s241_s12 = scalar_select %p240_p11, %s2820_s21, 1 }
  0x17   : > { %v248_v10 = vld [vmem:[%s4406_s2] sm:$0xff]  ;;  %v249_v11 = vld [vmem:[%s4406_s2 + $0x8] sm:$0xff]  ;;  %v250_v12 = vld [vmem:[%s4406_s2 + $0x10] sm:$0xff]  ;;  %s3855_s14 = scalar_lea.vmem [#allocation2], %s3815_s29  ;;  %s2691_s7 = smul.u32 9216, %s2820_s21 }
  0x18   : > { %v251_v13 = vld [vmem:[%s4406_s2 + $0x18] sm:$0xff]  ;;  %v252_v14 = vld [vmem:[%s4406_s2 + $0x20] sm:$0xff]  ;;  %v253_v15 = vld [vmem:[%s4406_s2 + $0x28] sm:$0xff]  ;;  %s2690_s17 = smul.u32 576, %s241_s12  ;;  %s2224_s8 = sshll.u32 %s3855_s14, 4  ;;  %s4354_s8 = int_to_ptr.vmem [resolvable:$true] %s2224_s8 }
  0x19   : > { %v254_v16 = vld [vmem:[%s4406_s2 + $0x30] sm:$0xff]  ;;  %v255_v17 = vld [vmem:[%s4406_s2 + $0x38] sm:$0xff]  ;;  %v256_v18 = vld [vmem:[%s4406_s2 + $0x40] sm:$0xff]  ;;  %s4352_s12 = scalar_lea.hbm %s4409_s5, %s2691_s7  ;;  %s4359_s21 = scalar_lea.sflag [#allocation3], %s237_s27 }
  0x1a   : > { %292 = vperm.xlu1 %2751, %v260_v3   ;;  %282 = vperm.xlu0 %2750, %v258_v4   ;;  %v2308_v19 = vld [vmem:[%s4405_s1 + $0x48] sm:$0xff]  ;;  %v2309_v20 = vld [vmem:[%s4405_s1 + $0x50] sm:$0xff]  ;;  %v2310_v21 = vld [vmem:[%s4405_s1 + $0x58] sm:$0xff]  ;;  %s3488_s9 = scalar_lea.vmem %s4404_s0, %s2690_s17  ;;  %s2756_s15 = sshll.u32 %s2831_s13, 4  ;;  %s2757_s15 = int_to_ptr.vmem [resolvable:$false] %s2756_s15 }
  0x1b   : > { %v2311_v22 = vld [vmem:[%s4405_s1 + $0x60] sm:$0xff]  ;;  %v2312_v23 = vld [vmem:[%s4405_s1 + $0x68] sm:$0xff]  ;;  %v2313_v24 = vld [vmem:[%s4405_s1 + $0x70] sm:$0xff]  ;;  %s2758_s16 = scalar_lea.vmem %s2757_s15, 18432  ;;  %p2759_p1 = scmp.lt.s32.totalorder %s4354_s8, %s2757_s15 }
  0x1c   : > { %v2314_v25 = vld [vmem:[%s4405_s1 + $0x78] sm:$0xff]  ;;  %v2315_v26 = vld [vmem:[%s4405_s1 + $0x80] sm:$0xff]  ;;  %v2316_v27 = vld [vmem:[%s4405_s1 + $0x88] sm:$0xff] }
  0x1d   : > { %v2326_v28 = vld [vmem:[%s4405_s1 + $0x90] sm:$0xff]  ;;  %v2327_v29 = vld [vmem:[%s4405_s1 + $0x98] sm:$0xff]  ;;  %v2328_v30 = vld [vmem:[%s4405_s1 + $0xa0] sm:$0xff] }
  0x1e   : > { %302 = vperm.xlu1 %2751, %v262_v5   ;;  %297 = vperm.xlu0 %2750, %v261_v6   ;;  %v2329_v31 = vld [vmem:[%s4405_s1 + $0xa8] sm:$0xff]  ;;  %v2330_v32 = vld [vmem:[%s4405_s1 + $0xb0] sm:$0xff]  ;;  %v2331_v33 = vld [vmem:[%s4405_s1 + $0xb8] sm:$0xff] }
  0x1f   : > { %v2332_v34 = vld [vmem:[%s4405_s1 + $0xc0] sm:$0xff]  ;;  %v2333_v35 = vld [vmem:[%s4405_s1 + $0xc8] sm:$0xff]  ;;  %v2334_v36 = vld [vmem:[%s4405_s1 + $0xd0] sm:$0xff] }
  0x20   : > { %v2344_v37 = vld [vmem:[%s4405_s1 + $0xd8] sm:$0xff]  ;;  %v2345_v38 = vld [vmem:[%s4405_s1 + $0xe0] sm:$0xff]  ;;  %v2346_v39 = vld [vmem:[%s4405_s1 + $0xe8] sm:$0xff] }
  0x21   : > { %v2347_v40 = vld [vmem:[%s4405_s1 + $0xf0] sm:$0xff]  ;;  %v2348_v41 = vld [vmem:[%s4405_s1 + $0xf8] sm:$0xff]  ;;  %v2349_v42 = vld [vmem:[%s4405_s1 + $0x100] sm:$0xff] }
  0x22   : > { %312 = vperm.xlu1 %2751, %v264_v7   ;;  %307 = vperm.xlu0 %2750, %v263_v8   ;;  %v2350_v43 = vld [vmem:[%s4405_s1 + $0x108] sm:$0xff]  ;;  %v2351_v44 = vld [vmem:[%s4405_s1 + $0x110] sm:$0xff]  ;;  %v2352_v45 = vld [vmem:[%s4405_s1 + $0x118] sm:$0xff] }
  0x23   : > { %v2362_v46 = vld [vmem:[%s4405_s1 + $0x120] sm:$0xff]  ;;  %v2363_v47 = vld [vmem:[%s4405_s1 + $0x128] sm:$0xff]  ;;  %v2364_v48 = vld [vmem:[%s4405_s1 + $0x130] sm:$0xff] }
  0x24   : > { %v2365_v49 = vld [vmem:[%s4405_s1 + $0x138] sm:$0xff]  ;;  %v2366_v50 = vld [vmem:[%s4405_s1 + $0x140] sm:$0xff]  ;;  %v2367_v51 = vld [vmem:[%s4405_s1 + $0x148] sm:$0xff] }
  0x25   : > { %v2368_v52 = vld [vmem:[%s4405_s1 + $0x150] sm:$0xff]  ;;  %v2369_v53 = vld [vmem:[%s4405_s1 + $0x158] sm:$0xff]  ;;  %v2370_v54 = vld [vmem:[%s4405_s1 + $0x160] sm:$0xff] }
  0x26   : > { %317 = vperm.xlu0 %2750, %v265_v9   ;;  %331 = vperm.xlu1 %2751, %v248_v10   ;;  %v2380_v55 = vld [vmem:[%s4405_s1 + $0x168] sm:$0xff]  ;;  %v2381_v56 = vld [vmem:[%s4405_s1 + $0x170] sm:$0xff]  ;;  %v2382_v57 = vld [vmem:[%s4405_s1 + $0x178] sm:$0xff] }
  0x27   : > { %v2383_v58 = vld [vmem:[%s4405_s1 + $0x180] sm:$0xff]  ;;  %v2384_v59 = vld [vmem:[%s4405_s1 + $0x188] sm:$0xff]  ;;  %v2385_v60 = vld [vmem:[%s4405_s1 + $0x190] sm:$0xff] }
  0x28   : > { %v2386_v61 = vld [vmem:[%s4405_s1 + $0x198] sm:$0xff]  ;;  %v2387_v62 = vld [vmem:[%s4405_s1 + $0x1a0] sm:$0xff]  ;;  %v2388_v63 = vld [vmem:[%s4405_s1 + $0x1a8] sm:$0xff] }
  0x29   : > { %v2398_v0 = vld [vmem:[%s4405_s1 + $0x1b0] sm:$0xff]  ;;  %v2399_v4 = vld [vmem:[%s4405_s1 + $0x1b8] sm:$0xff]  ;;  %v2400_v5 = vld [vmem:[%s4405_s1 + $0x1c0] sm:$0xff] }
  0x2a   : > { %336 = vperm.xlu0 %2750, %v249_v11   ;;  %341 = vperm.xlu1 %2751, %v250_v12   ;;  %v2401_v8 = vld [vmem:[%s4405_s1 + $0x1c8] sm:$0xff]  ;;  %v2402_v9 = vld [vmem:[%s4405_s1 + $0x1d0] sm:$0xff]  ;;  %v2403_v12 = vld [vmem:[%s4405_s1 + $0x1d8] sm:$0xff] }
  0x2e   : > { %346 = vperm.xlu0 %2750, %v251_v13   ;;  %351 = vperm.xlu1 %2751, %v252_v14   ;;  %v2404_v13 = vld [vmem:[%s4405_s1 + $0x1e0] sm:$0xff] }
  0x32   : > { %356 = vperm.xlu0 %2750, %v253_v15   ;;  %361 = vperm.xlu1 %2751, %v254_v16   ;;  %v2405_v16 = vld [vmem:[%s4405_s1 + $0x1e8] sm:$0xff] }
  0x36   : > { %366 = vperm.xlu0 %2750, %v255_v17   ;;  %371 = vperm.xlu1 %2751, %v256_v18   ;;  %v2406_v17 = vld [vmem:[%s4405_s1 + $0x1f0] sm:$0xff] }
  0x3a   : > { %405 = vperm.xlu0 %2750, %v2308_v19   ;;  %410 = vperm.xlu1 %2751, %v2309_v20   ;;  %v2416_v20 = vld [vmem:[%s4405_s1 + $0x1f8] sm:$0xff] }
  0x3e   : > { %415 = vperm.xlu0 %2750, %v2310_v21   ;;  %420 = vperm.xlu1 %2751, %v2311_v22   ;;  %v2417_v21 = vld [vmem:[%s4405_s1 + $0x200] sm:$0xff] }
  0x42   : > { %425 = vperm.xlu0 %2750, %v2312_v23   ;;  %430 = vperm.xlu1 %2751, %v2313_v24   ;;  %v2418_v24 = vld [vmem:[%s4405_s1 + $0x208] sm:$0xff] }
  0x46   : > { %435 = vperm.xlu0 %2750, %v2314_v25   ;;  %440 = vperm.xlu1 %2751, %v2315_v26   ;;  %v2419_v25 = vld [vmem:[%s4405_s1 + $0x210] sm:$0xff] }
  0x4a   : > { %445 = vperm.xlu0 %2750, %v2316_v27   ;;  %488 = vperm.xlu1 %2751, %v2326_v28   ;;  %v2420_v28 = vld [vmem:[%s4405_s1 + $0x218] sm:$0xff] }
  0x4e   : > { %493 = vperm.xlu0 %2750, %v2327_v29   ;;  %498 = vperm.xlu1 %2751, %v2328_v30   ;;  %v2421_v29 = vld [vmem:[%s4405_s1 + $0x220] sm:$0xff] }
  0x52   : > { %503 = vperm.xlu0 %2750, %v2329_v31   ;;  %508 = vperm.xlu1 %2751, %v2330_v32   ;;  %v2422_v32 = vld [vmem:[%s4405_s1 + $0x228] sm:$0xff] }
  0x56   : > { %513 = vperm.xlu0 %2750, %v2331_v33   ;;  %518 = vperm.xlu1 %2751, %v2332_v34   ;;  %v2423_v33 = vld [vmem:[%s4405_s1 + $0x230] sm:$0xff] }
  0x5a   : > { %523 = vperm.xlu0 %2750, %v2333_v35   ;;  %528 = vperm.xlu1 %2751, %v2334_v36   ;;  %v2424_v36 = vld [vmem:[%s4405_s1 + $0x238] sm:$0xff] }
  0x5e   : > { %571 = vperm.xlu0 %2750, %v2344_v37   ;;  %576 = vperm.xlu1 %2751, %v2345_v38   ;;  %v991_v37 = vld [vmem:[%s4408_s4] sm:$0xff] }
  0x62   : > { %581 = vperm.xlu0 %2750, %v2346_v39   ;;  %586 = vperm.xlu1 %2751, %v2347_v40   ;;  %v992_v40 = vld [vmem:[%s4408_s4 + $0x8] sm:$0xff] }
  0x66   : > { %591 = vperm.xlu0 %2750, %v2348_v41   ;;  %596 = vperm.xlu1 %2751, %v2349_v42   ;;  %v993_v41 = vld [vmem:[%s4408_s4 + $0x10] sm:$0xff] }
  0x6a   : > { %601 = vperm.xlu0 %2750, %v2350_v43   ;;  %606 = vperm.xlu1 %2751, %v2351_v44   ;;  %v994_v44 = vld [vmem:[%s4408_s4 + $0x18] sm:$0xff] }
  0x6e   : > { %611 = vperm.xlu0 %2750, %v2352_v45   ;;  %654 = vperm.xlu1 %2751, %v2362_v46   ;;  %v995_v45 = vld [vmem:[%s4408_s4 + $0x20] sm:$0xff] }
  0x72   : > { %659 = vperm.xlu0 %2750, %v2363_v47   ;;  %664 = vperm.xlu1 %2751, %v2364_v48   ;;  %v996_v48 = vld [vmem:[%s4408_s4 + $0x28] sm:$0xff] }
  0x76   : > { %669 = vperm.xlu0 %2750, %v2365_v49   ;;  %674 = vperm.xlu1 %2751, %v2366_v50   ;;  %v997_v49 = vld [vmem:[%s4408_s4 + $0x30] sm:$0xff] }
  0x7a   : > { %679 = vperm.xlu0 %2750, %v2367_v51   ;;  %684 = vperm.xlu1 %2751, %v2368_v52   ;;  %v973_v52 = vld [vmem:[%s4407_s3] sm:$0xff] }
  0x7b   : > { %vm982_vm0 = vcmp.gt.f32.partialorder %v973_v52, 0.5  ;;  %v2455_v52 = vld [vmem:[%s4408_s4 + $0x60] sm:$0xff] }
  0x7e   : > { %689 = vperm.xlu0 %2750, %v2369_v53   ;;  %694 = vperm.xlu1 %2751, %v2370_v54   ;;  %v974_v53 = vld [vmem:[%s4407_s3 + $0x8] sm:$0xff]  ;;  %v998_v54 = vld [vmem:[%s4408_s4 + $0x38] sm:$0xff] }
  0x7f   : > { %vm983_vm1 = vcmp.gt.f32.partialorder %v974_v53, 0.5  ;;  %v2456_v53 = vld [vmem:[%s4408_s4 + $0x68] sm:$0xff] }
  0x82   : > { %737 = vperm.xlu0 %2750, %v2380_v55   ;;  %742 = vperm.xlu1 %2751, %v2381_v56   ;;  %v999_v55 = vld [vmem:[%s4408_s4 + $0x40] sm:$0xff] }
  0x86   : > { %747 = vperm.xlu0 %2750, %v2382_v57   ;;  %752 = vperm.xlu1 %2751, %v2383_v58   ;;  %v975_v58 = vld [vmem:[%s4407_s3 + $0x10] sm:$0xff] }
  0x87   : > { %vm984_vm2 = vcmp.gt.f32.partialorder %v975_v58, 0.5  ;;  %v2457_v58 = vld [vmem:[%s4408_s4 + $0x70] sm:$0xff] }
  0x8a   : > { %757 = vperm.xlu0 %2750, %v2384_v59   ;;  %762 = vperm.xlu1 %2751, %v2385_v60   ;;  %v976_v59 = vld [vmem:[%s4407_s3 + $0x18] sm:$0xff]  ;;  %v1054_v60 = vsel %vm982_vm0, 1, %v4410_v2 }
  0x8b   : > { %vm985_vm3 = vcmp.gt.f32.partialorder %v976_v59, 0.5  ;;  %v2458_v59 = vld [vmem:[%s4408_s4 + $0x78] sm:$0xff] }
  0x8e   : > { %767 = vperm.xlu0 %2750, %v2386_v61   ;;  %772 = vperm.xlu1 %2751, %v2387_v62   ;;  %v1055_v61 = vsel %vm983_vm1, 1, %v4410_v2 }
  0x91   : > { %v3113_v1 = vpop.permute.xlu1 %287  ;;  %v3115_v3 = vpop.permute.xlu0 %277 }
  0x92   : > { %777 = vperm.xlu0 %2750, %v2388_v63   ;;  %820 = vperm.xlu1 %2751, %v2398_v0   ;;  %v977_v0 = vld [vmem:[%s4407_s3 + $0x20] sm:$0xff] }
  0x93   : > { %vm986_vm4 = vcmp.gt.f32.partialorder %v977_v0, 0.5  ;;  %v2443_v0 = vld [vmem:[%s4407_s3 + $0x48] sm:$0xff] }
  0x94   : > { %vm1136_vm9 = vcmp.gt.f32.partialorder %v2443_v0, 0.5  ;;  %v2450_v0 = vld [vmem:[%s4407_s3 + $0x80] sm:$0xff] }
  0x95   : > { %v3123_v6 = vpop.permute.xlu1 %292  ;;  %v3125_v7 = vpop.permute.xlu0 %282  ;;  %vm1143_vm0 = vcmp.gt.f32.partialorder %v2450_v0, 0.5 }
  0x96   : > { %825 = vperm.xlu0 %2750, %v2399_v4   ;;  %830 = vperm.xlu1 %2751, %v2400_v5   ;;  %v978_v4 = vld [vmem:[%s4407_s3 + $0x28] sm:$0xff]  ;;  %v1056_v5 = vsel %vm984_vm2, 1, %v4410_v2 }
  0x97   : > { %vm987_vm5 = vcmp.gt.f32.partialorder %v978_v4, 0.5  ;;  %v2444_v4 = vld [vmem:[%s4407_s3 + $0x50] sm:$0xff] }
  0x98   : > { %vm1137_vm10 = vcmp.gt.f32.partialorder %v2444_v4, 0.5 }
  0x99   : > { %v3133_v10 = vpop.permute.xlu1 %302  ;;  %v3135_v11 = vpop.permute.xlu0 %297 }
  0x9a   : > { %835 = vperm.xlu0 %2750, %v2401_v8   ;;  %840 = vperm.xlu1 %2751, %v2402_v9   ;;  %v1057_v8 = vsel %vm985_vm3, 1, %v4410_v2 }
  0x9d   : > { %v3143_v14 = vpop.permute.xlu1 %312  ;;  %v3145_v15 = vpop.permute.xlu0 %307 }
  0x9e   : > { %845 = vperm.xlu0 %2750, %v2403_v12   ;;  %850 = vperm.xlu1 %2751, %v2404_v13   ;;  %v979_v13 = vld [vmem:[%s4407_s3 + $0x30] sm:$0xff] }
  0x9f   : > { %vm988_vm6 = vcmp.gt.f32.partialorder %v979_v13, 0.5 }
  0xa1   : > { %v3153_v18 = vpop.permute.xlu0 %317  ;;  %v3155_v19 = vpop.permute.xlu1 %331 }
  0xa2   : > { %855 = vperm.xlu0 %2750, %v2405_v16   ;;  %860 = vperm.xlu1 %2751, %v2406_v17   ;;  %v980_v16 = vld [vmem:[%s4407_s3 + $0x38] sm:$0xff]  ;;  %v1058_v17 = vsel %vm986_vm4, 1, %v4410_v2 }
  0xa3   : > { %vm989_vm7 = vcmp.gt.f32.partialorder %v980_v16, 0.5 }
  0xa5   : > { %v3163_v22 = vpop.permute.xlu0 %336  ;;  %v3165_v23 = vpop.permute.xlu1 %341 }
  0xa6   : > { %903 = vperm.xlu0 %2750, %v2416_v20   ;;  %908 = vperm.xlu1 %2751, %v2417_v21   ;;  %v1059_v20 = vsel %vm987_vm5, 1, %v4410_v2 }
  0xa9   : > { %v3173_v26 = vpop.permute.xlu0 %346  ;;  %v3175_v27 = vpop.permute.xlu1 %351 }
  0xaa   : > { %913 = vperm.xlu0 %2750, %v2418_v24   ;;  %918 = vperm.xlu1 %2751, %v2419_v25   ;;  %v981_v25 = vld [vmem:[%s4407_s3 + $0x40] sm:$0xff] }
  0xab   : > { %vm990_vm8 = vcmp.gt.f32.partialorder %v981_v25, 0.5  ;;  %v1209_v25 = vsel %vm1136_vm9, 1, %v4410_v2 }
  0xad   : > { %v3183_v30 = vpop.permute.xlu0 %356  ;;  %v3185_v31 = vpop.permute.xlu1 %361 }
  0xae   : > { %923 = vperm.xlu0 %2750, %v2420_v28   ;;  %928 = vperm.xlu1 %2751, %v2421_v29   ;;  %v1060_v28 = vsel %vm988_vm6, 1, %v4410_v2  ;;  %v1061_v29 = vsel %vm989_vm7, 1, %v4410_v2 }
  0xb1   : > { %v3193_v34 = vpop.permute.xlu0 %366  ;;  %v3195_v35 = vpop.permute.xlu1 %371 }
  0xb2   : > { %933 = vperm.xlu0 %2750, %v2422_v32   ;;  %938 = vperm.xlu1 %2751, %v2423_v33  }
  0xb5   : > { %v3203_v38 = vpop.permute.xlu0 %405  ;;  %v3205_v39 = vpop.permute.xlu1 %410 }
  0xb6   : > { %943 = vperm.xlu0 %2750, %v2424_v36   ;;  %1002 = vperm.xlu1 %2751, %v991_v37   ;;  %v1062_v36 = vsel %vm990_vm8, 1, %v4410_v2  ;;  %v2452_v37 = vld [vmem:[%s4408_s4 + $0x48] sm:$0xff] }
  0xb9   : > { %v3213_v42 = vpop.permute.xlu0 %415  ;;  %v3215_v43 = vpop.permute.xlu1 %420 }
  0xba   : > { %1007 = vperm.xlu0 %2750, %v992_v40   ;;  %1012 = vperm.xlu1 %2751, %v993_v41  }
  0xbd   : > { %v3223_v46 = vpop.permute.xlu0 %425  ;;  %v3225_v47 = vpop.permute.xlu1 %430 }
  0xbe   : > { %1017 = vperm.xlu0 %2750, %v994_v44   ;;  %1022 = vperm.xlu1 %2751, %v995_v45   ;;  %v2453_v44 = vld [vmem:[%s4408_s4 + $0x50] sm:$0xff]  ;;  %v2454_v45 = vld [vmem:[%s4408_s4 + $0x58] sm:$0xff] }
  0xc1   : > { %v3233_v50 = vpop.permute.xlu0 %435  ;;  %v3235_v51 = vpop.permute.xlu1 %440 }
  0xc2   : > { %1027 = vperm.xlu0 %2750, %v996_v48   ;;  %1032 = vperm.xlu1 %2751, %v997_v49  }
  0xc5   : > { %v3249_v56 = vpop.permute.xlu0 %445  ;;  %v3251_v57 = vpop.permute.xlu1 %488 }
  0xc6   : > { %1037 = vperm.xlu0 %2750, %v998_v54   ;;  %1042 = vperm.xlu1 %2751, %v999_v55  }
  0xc9   : > { %v3261_v62 = vpop.permute.xlu0 %493  ;;  %v3263_v63 = vpop.permute.xlu1 %498 }
  0xca   : > { %1064 = vperm.xlu0 %2750, %v1054_v60   ;;  %1067 = vperm.xlu1 %2751, %v1055_v61  }
  0xcd   : > { %v3273_v9 = vpop.permute.xlu0 %503  ;;  %v3275_v12 = vpop.permute.xlu1 %508 }
  0xce   : > { %1070 = vperm.xlu0 %2750, %v1056_v5   ;;  %1073 = vperm.xlu1 %2751, %v1057_v8   ;;  %v2459_v5 = vld [vmem:[%s4408_s4 + $0x80] sm:$0xff]  ;;  %v2460_v8 = vld [vmem:[%s4408_s4 + $0x88] sm:$0xff] }
  0xd1   : > { %v3285_v21 = vpop.permute.xlu0 %513  ;;  %v3287_v24 = vpop.permute.xlu1 %518 }
  0xd2   : > { %1076 = vperm.xlu0 %2750, %v1058_v17   ;;  %1079 = vperm.xlu1 %2751, %v1059_v20   ;;  %v2445_v17 = vld [vmem:[%s4407_s3 + $0x58] sm:$0xff]  ;;  %v2446_v20 = vld [vmem:[%s4407_s3 + $0x60] sm:$0xff] }
  0xd3   : > { %vm1138_vm11 = vcmp.gt.f32.partialorder %v2445_v17, 0.5  ;;  %vm1139_vm12 = vcmp.gt.f32.partialorder %v2446_v20, 0.5  ;;  %v2451_v20 = vld [vmem:[%s4407_s3 + $0x88] sm:$0xff] }
  0xd4   : > { %vm1144_vm1 = vcmp.gt.f32.partialorder %v2451_v20, 0.5 }
  0xd5   : > { %v3294_v32 = vpop.permute.xlu0 %523  ;;  %v3296_v33 = vpop.permute.xlu1 %528 }
  0xd6   : > { %1082 = vperm.xlu0 %2750, %v1060_v28   ;;  %1085 = vperm.xlu1 %2751, %v1061_v29   ;;  %v1210_v28 = vsel %vm1137_vm10, 1, %v4410_v2 }
  0xd9   : > { %v3302_v40 = vpop.permute.xlu0 %571  ;;  %v3304_v41 = vpop.permute.xlu1 %576 }
  0xda   : > { %1088 = vperm.xlu0 %2750, %v1062_v36   ;;  %1157 = vperm.xlu1 %2751, %v2452_v37   ;;  %v2447_v37 = vld [vmem:[%s4407_s3 + $0x68] sm:$0xff] }
  0xdb   : > { %vm1140_vm13 = vcmp.gt.f32.partialorder %v2447_v37, 0.5 }
  0xdc   : > { %v1213_v4 = vsel %vm1140_vm13, 1, %v4410_v2 }
  0xdd   : > { %v3312_v48 = vpop.permute.xlu0 %581  ;;  %v3314_v49 = vpop.permute.xlu1 %586 }
  0xde   : > { %1162 = vperm.xlu0 %2750, %v2453_v44   ;;  %1167 = vperm.xlu1 %2751, %v2454_v45   ;;  %v2448_v44 = vld [vmem:[%s4407_s3 + $0x70] sm:$0xff]  ;;  %v1211_v45 = vsel %vm1138_vm11, 1, %v4410_v2 }
  0xdf   : > { %vm1141_vm14 = vcmp.gt.f32.partialorder %v2448_v44, 0.5 }
  0xe1   : > { %v3322_v54 = vpop.permute.xlu0 %591  ;;  %v3324_v55 = vpop.permute.xlu1 %596 }
  0xe2   : > { %1172 = vperm.xlu0 %2750, %v2455_v52   ;;  %1177 = vperm.xlu1 %2751, %v2456_v53   ;;  %v1212_v52 = vsel %vm1139_vm12, 1, %v4410_v2 }
  0xe5   : > { %v3332_v60 = vpop.permute.xlu0 %601  ;;  %v3334_v61 = vpop.permute.xlu1 %606 }
  0xe6   : > { %1182 = vperm.xlu0 %2750, %v2457_v58   ;;  %1187 = vperm.xlu1 %2751, %v2458_v59   ;;  %v2449_v59 = vld [vmem:[%s4407_s3 + $0x78] sm:$0xff] }
  0xe7   : > { %vm1142_vm15 = vcmp.gt.f32.partialorder %v2449_v59, 0.5 }
  0xe9   : > { %v3348_v13 = vpop.permute.xlu0 %611  ;;  %v3350_v16 = vpop.permute.xlu1 %654 }
  0xea   : > { %4423 = vst [vmem:[#allocation5_spill] sm:$0xff] %v3350_v16  ;;  %1192 = vperm.xlu0 %2750, %v2459_v5   ;;  %1197 = vperm.xlu1 %2751, %v2460_v8   ;;  %v1214_v5 = vsel %vm1141_vm14, 1, %v4410_v2  ;;  %v2524_v16 = vld [vmem:[%s4408_s4 + $0xd8] sm:$0xff] }
  0xed   : > { %v3360_v29 = vpop.permute.xlu0 %659  ;;  %v3362_v36 = vpop.permute.xlu1 %664 }
  0xee   : > { %4424 = vst [vmem:[#allocation6_spill] sm:$0xff] %v3360_v29  ;;  %4425 = vst [vmem:[#allocation7_spill] sm:$0xff] %v3362_v36  ;;  %1219 = vperm.xlu0 %2750, %v1209_v25   ;;  %1222 = vperm.xlu1 %2751, %v1210_v28   ;;  %v1215_v25 = vsel %vm1142_vm15, 1, %v4410_v2  ;;  %v1216_v28 = vsel %vm1143_vm0, 1, %v4410_v2 }
  0xf1   : > { %v3372_v53 = vpop.permute.xlu0 %669  ;;  %v3374_v58 = vpop.permute.xlu1 %674 }
  0xf2   : > { %4426 = vst [vmem:[#allocation8_spill] sm:$0xff] %v3372_v53  ;;  %4427 = vst [vmem:[#allocation9_spill] sm:$0xff] %v3374_v58  ;;  %1225 = vperm.xlu0 %2750, %v1211_v45   ;;  %1228 = vperm.xlu1 %2751, %v1212_v52   ;;  %v1217_v45 = vsel %vm1144_vm1, 1, %v4410_v2  ;;  %v2488_v52 = vld [vmem:[%s4408_s4 + $0x90] sm:$0xff]  ;;  %v3528_v58 = vld [vmem:[%s3488_s9 + $0x40] sm:$0xff] }
  0xf3   : > { %4459 = vst [vmem:[#allocation40_spill] sm:$0xff] %v3528_v58  ;;  %v2317_v53 = vld [vmem:[%s3488_s9 + $0x48] sm:$0xff] }
  0xf5   : > { %v3384_v8 = vpop.permute.xlu0 %679  ;;  %v3386_v17 = vpop.permute.xlu1 %684 }
  0xf6   : > { %4428 = vst [vmem:[#allocation10_spill] sm:$0xff] %v3384_v8  ;;  %4429 = vst [vmem:[#allocation11_spill] sm:$0xff] %v3386_v17  ;;  %1231 = vperm.xlu0 %2750, %v1213_v4   ;;  %1234 = vperm.xlu1 %2751, %v1214_v5   ;;  %v2489_v4 = vld [vmem:[%s4408_s4 + $0x98] sm:$0xff]  ;;  %v2490_v5 = vld [vmem:[%s4408_s4 + $0xa0] sm:$0xff] }
  0xf7   : > { %v3525_v8 = vld [vmem:[%s3488_s9 + $0x30] sm:$0xff] }
  0xf8   : > { %4458 = vst [vmem:[#allocation39_spill] sm:$0xff] %v3525_v8 }
  0xf9   : > { %v3393_v37 = vpop.permute.xlu0 %689  ;;  %v3395_v44 = vpop.permute.xlu1 %694 }
  0xfa   : > { %4430 = vst [vmem:[#allocation12_spill] sm:$0xff] %v3393_v37  ;;  %4431 = vst [vmem:[#allocation13_spill] sm:$0xff] %v3395_v44  ;;  %1237 = vperm.xlu0 %2750, %v1215_v25   ;;  %1240 = vperm.xlu1 %2751, %v1216_v28   ;;  %v2491_v28 = vld [vmem:[%s4408_s4 + $0xa8] sm:$0xff] }
  0xfd   : > { %v3401_v59 = vpop.permute.xlu0 %737  ;;  %v3403_v0 = vpop.permute.xlu1 %742 }
  0xfe   : > { %4432 = vst [vmem:[#allocation14_spill] sm:$0xff] %v3401_v59  ;;  %4433 = vst [vmem:[#allocation15_spill] sm:$0xff] %v3403_v0  ;;  %1243 = vperm.xlu0 %2750, %v1217_v45   ;;  %1313 = vperm.xlu1 %2751, %v2488_v52   ;;  %v2492_v45 = vld [vmem:[%s4408_s4 + $0xb0] sm:$0xff]  ;;  %v3512_v0 = vld [vmem:[%s3488_s9 + $0x28] sm:$0xff] }
  0xff   : > { %4453 = vst [vmem:[#allocation34_spill] sm:$0xff] %v3512_v0  ;;  %v3515_v59 = vld [vmem:[%s3488_s9 + $0x20] sm:$0xff] }
 0x100   : > { %4454 = vst [vmem:[#allocation35_spill] sm:$0xff] %v3515_v59 }
 0x101   : > { %v3411_v20 = vpop.permute.xlu0 %747  ;;  %v3413_v25 = vpop.permute.xlu1 %752 }
 0x102   : > { %4434 = vst [vmem:[#allocation16_spill] sm:$0xff] %v3411_v20  ;;  %4435 = vst [vmem:[#allocation17_spill] sm:$0xff] %v3413_v25  ;;  %1318 = vperm.xlu0 %2750, %v2489_v4   ;;  %1323 = vperm.xlu1 %2751, %v2490_v5   ;;  %v2493_v4 = vld [vmem:[%s4408_s4 + $0xb8] sm:$0xff]  ;;  %v2494_v5 = vld [vmem:[%s4408_s4 + $0xc0] sm:$0xff]  ;;  %v4442_v25 = vmov 0  }
 0x105   : > { %v3421_v52 = vpop.permute.xlu0 %757  ;;  %v3423_v2 = vpop.permute.xlu1 %762 }
 0x106   : > { %4436 = vst [vmem:[#allocation18_spill] sm:$0xff] %v3421_v52  ;;  %4437 = vst [vmem:[#allocation19_spill] sm:$0xff] %v3423_v2  ;;  %1328 = vperm.xlu0 %2750, %v2491_v28   ;;  %1333 = vperm.xlu1 %2751, %v2492_v45   ;;  %v2479_v52 = vld [vmem:[%s4407_s3 + $0x90] sm:$0xff]  ;;  %v2480_v28 = vld [vmem:[%s4407_s3 + $0x98] sm:$0xff] }
 0x107   : > { %v2495_v45 = vld [vmem:[%s4408_s4 + $0xc8] sm:$0xff]  ;;  %vm1292_vm2 = vcmp.gt.f32.partialorder %v2479_v52, 0.5  ;;  %vm1293_vm3 = vcmp.gt.f32.partialorder %v2480_v28, 0.5 }
 0x108   : > { %v1365_v20 = vsel %vm1292_vm2, 1, %v4442_v25  ;;  %v1366_v52 = vsel %vm1293_vm3, 1, %v4442_v25 }
 0x109   : > { %v3431_v44 = vpop.permute.xlu0 %767  ;;  %v3433_v37 = vpop.permute.xlu1 %772 }
 0x10a   : > { %4438 = vst [vmem:[#allocation20_spill] sm:$0xff] %v3431_v44  ;;  %4439 = vst [vmem:[#allocation21_spill] sm:$0xff] %v3433_v37  ;;  %1338 = vperm.xlu0 %2750, %v2493_v4   ;;  %1343 = vperm.xlu1 %2751, %v2494_v5   ;;  %v2496_v44 = vld [vmem:[%s4408_s4 + $0xd0] sm:$0xff]  ;;  %v2481_v4 = vld [vmem:[%s4407_s3 + $0xa0] sm:$0xff] }
 0x10b   : > { %v2482_v5 = vld [vmem:[%s4407_s3 + $0xa8] sm:$0xff]  ;;  %vm1294_vm4 = vcmp.gt.f32.partialorder %v2481_v4, 0.5 }
 0x10c   : > { %vm1295_vm5 = vcmp.gt.f32.partialorder %v2482_v5, 0.5 }
 0x10d   : > { %v3448_v37 = vpop.permute.xlu0 %777  ;;  %v3450_v2 = vpop.permute.xlu1 %820  ;;  %v1368_v4 = vsel %vm1295_vm5, 1, %v4442_v25 }
 0x10e   : > { %4440 = vst [vmem:[#allocation22_spill] sm:$0xff] %v3448_v37  ;;  %4441 = vst [vmem:[#allocation23_spill] sm:$0xff] %v3450_v2  ;;  %1348 = vperm.xlu0 %2750, %v2495_v45   ;;  %1353 = vperm.xlu1 %2751, %v2496_v44   ;;  %v2483_v2 = vld [vmem:[%s4407_s3 + $0xb0] sm:$0xff]  ;;  %v2484_v45 = vld [vmem:[%s4407_s3 + $0xb8] sm:$0xff]  ;;  %v1367_v44 = vsel %vm1294_vm4, 1, %v4442_v25 }
 0x10f   : > { %vm1296_vm6 = vcmp.gt.f32.partialorder %v2483_v2, 0.5  ;;  %vm1297_vm7 = vcmp.gt.f32.partialorder %v2484_v45, 0.5 }
 0x110   : > { %v1370_v2 = vsel %vm1297_vm7, 1, %v4442_v25 }
 0x111   : > { %v3461_v28 = vpop.permute.xlu0 %825  ;;  %v3463_v37 = vpop.permute.xlu1 %830 }
 0x112   : > { %4443 = vst [vmem:[#allocation24_spill] sm:$0xff] %v3461_v28  ;;  %4444 = vst [vmem:[#allocation25_spill] sm:$0xff] %v3463_v37  ;;  %1375 = vperm.xlu0 %2750, %v1365_v20   ;;  %1378 = vperm.xlu1 %2751, %v1366_v52   ;;  %v2485_v28 = vld [vmem:[%s4407_s3 + $0xc0] sm:$0xff]  ;;  %v2486_v20 = vld [vmem:[%s4407_s3 + $0xc8] sm:$0xff]  ;;  %v1369_v52 = vsel %vm1296_vm6, 1, %v4442_v25 }
 0x113   : > { %vm1298_vm8 = vcmp.gt.f32.partialorder %v2485_v28, 0.5  ;;  %vm1299_vm9 = vcmp.gt.f32.partialorder %v2486_v20, 0.5  ;;  %v2487_v28 = vld [vmem:[%s4407_s3 + $0xd0] sm:$0xff] }
 0x114   : > { %v1371_v20 = vsel %vm1298_vm8, 1, %v4442_v25  ;;  %vm1300_vm10 = vcmp.gt.f32.partialorder %v2487_v28, 0.5 }
 0x115   : > { %v3473_v5 = vpop.permute.xlu0 %835  ;;  %v3475_v37 = vpop.permute.xlu1 %840 }
 0x116   : > { %4445 = vst [vmem:[#allocation26_spill] sm:$0xff] %v3473_v5  ;;  %4446 = vst [vmem:[#allocation27_spill] sm:$0xff] %v3475_v37  ;;  %1381 = vperm.xlu0 %2750, %v1367_v44   ;;  %1384 = vperm.xlu1 %2751, %v1368_v4   ;;  %v3498_v4 = vld [vmem:[%s3488_s9 + $0x10] sm:$0xff]  ;;  %v1372_v37 = vsel %vm1299_vm9, 1, %v4442_v25  ;;  %v3503_v5 = vld [vmem:[%s3488_s9] sm:$0xff] }
 0x117   : > { %4449 = vst [vmem:[#allocation30_spill] sm:$0xff] %v3498_v4  ;;  %4450 = vst [vmem:[#allocation31_spill] sm:$0xff] %v3503_v5  ;;  %v322_v28 = vmul.f32 %v3113_v1, %v3498_v4  ;;  %v320_v36 = vmul.f32 %v3115_v3, %v3503_v5  ;;  %v325_v3 = vmul.f32 %v3133_v10, %v3512_v0  ;;  %v2516_v4 = vld [vmem:[%s4407_s3 + $0xe0] sm:$0xff]  ;;  %v2319_v0 = vld [vmem:[%s3488_s9 + $0x58] sm:$0xff] }
 0x118   : > { %vm1449_vm12 = vcmp.gt.f32.partialorder %v2516_v4, 0.5 }
 0x119   : > { %v3490_v45 = vpop.permute.xlu0 %845  ;;  %v3492_v44 = vpop.permute.xlu1 %850 }
 0x11a   : > { %4447 = vst [vmem:[#allocation28_spill] sm:$0xff] %v3490_v45  ;;  %4448 = vst [vmem:[#allocation29_spill] sm:$0xff] %v3492_v44  ;;  %1387 = vperm.xlu0 %2750, %v1369_v52   ;;  %1390 = vperm.xlu1 %2751, %v1370_v2   ;;  %v3506_v45 = vld [vmem:[%s3488_s9 + $0x18] sm:$0xff]  ;;  %v3509_v44 = vld [vmem:[%s3488_s9 + $0x8] sm:$0xff] }
 0x11b   : > { %4451 = vst [vmem:[#allocation32_spill] sm:$0xff] %v3506_v45  ;;  %4452 = vst [vmem:[#allocation33_spill] sm:$0xff] %v3509_v44  ;;  %v3518_v52 = vld [vmem:[%s3488_s9 + $0x38] sm:$0xff]  ;;  %v321_v29 = vmul.f32 %v3125_v7, %v3509_v44  ;;  %v323_v1 = vmul.f32 %v3123_v6, %v3506_v45  ;;  %v324_v7 = vmul.f32 %v3135_v11, %v3515_v59  ;;  %v2341_v59 = vld [vmem:[%s3488_s9 + $0xc0] sm:$0xff] }
 0x11c   : > { %4455 = vst [vmem:[#allocation36_spill] sm:$0xff] %v3518_v52  ;;  %v326_v44 = vmul.f32 %v3145_v15, %v3525_v8  ;;  %v328_v6 = vmul.f32 %v3153_v18, %v3528_v58  ;;  %v374_v45 = vadd.f32 %v3155_v19, %v320_v36  ;;  %v448_v15 = vmul.f32 %v2317_v53, %v3203_v38  ;;  %v2320_v18 = vld [vmem:[%s3488_s9 + $0x60] sm:$0xff]  ;;  %v2518_v19 = vld [vmem:[%s4407_s3 + $0xf0] sm:$0xff]  ;;  %v2321_v36 = vld [vmem:[%s3488_s9 + $0x68] sm:$0xff] }
 0x11d   : > { %v3520_v2 = vpop.permute.xlu0 %855  ;;  %v3522_v17 = vpop.permute.xlu1 %860  ;;  %v375_v10 = vadd.f32 %v3163_v22, %v321_v29  ;;  %v377_v22 = vadd.f32 %v3173_v26, %v323_v1  ;;  %v378_v29 = vadd.f32 %v3175_v27, %v324_v7  ;;  %v2525_v38 = vld [vmem:[%s4408_s4 + $0xe0] sm:$0xff]  ;;  %v2519_v26 = vld [vmem:[%s4407_s3 + $0xf8] sm:$0xff]  ;;  %v2322_v53 = vld [vmem:[%s3488_s9 + $0x70] sm:$0xff]  ;;  %vm1451_vm14 = vcmp.gt.f32.partialorder %v2518_v19, 0.5 }
 0x11e   : > { %4456 = vst [vmem:[#allocation37_spill] sm:$0xff] %v3520_v2  ;;  %4457 = vst [vmem:[#allocation38_spill] sm:$0xff] %v3522_v17  ;;  %1393 = vperm.xlu0 %2750, %v1371_v20   ;;  %1396 = vperm.xlu1 %2751, %v1372_v37   ;;  %v2318_v2 = vld [vmem:[%s3488_s9 + $0x50] sm:$0xff]  ;;  %v1373_v17 = vsel %vm1300_vm10, 1, %v4442_v25  ;;  %v2515_v37 = vld [vmem:[%s4407_s3 + $0xd8] sm:$0xff]  ;;  %v327_v20 = vmul.f32 %v3143_v14, %v3518_v52  ;;  %v376_v52 = vadd.f32 %v3165_v23, %v322_v28 }
 0x11f   : > { %v2517_v14 = vld [vmem:[%s4407_s3 + $0xe8] sm:$0xff]  ;;  %v449_v8 = vmul.f32 %v2318_v2, %v3205_v39  ;;  %vm1448_vm11 = vcmp.gt.f32.partialorder %v2515_v37, 0.5  ;;  %v379_v23 = vadd.f32 %v3183_v30, %v325_v3  ;;  %v450_v30 = vmul.f32 %v2319_v0, %v3213_v42  ;;  %v2323_v1 = vld [vmem:[%s3488_s9 + $0x78] sm:$0xff] }
 0x120   : > { %v2526_v39 = vld [vmem:[%s4408_s4 + $0xe8] sm:$0xff]  ;;  %v381_v27 = vadd.f32 %v3193_v34, %v327_v20  ;;  %vm1450_vm13 = vcmp.gt.f32.partialorder %v2517_v14, 0.5  ;;  %v382_v2 = vadd.f32 %v3195_v35, %v328_v6  ;;  %v451_v28 = vmul.f32 %v2320_v18, %v3215_v43  ;;  %v2335_v20 = vld [vmem:[%s3488_s9 + $0x90] sm:$0xff]  ;;  %v2336_v58 = vld [vmem:[%s3488_s9 + $0x98] sm:$0xff] }
 0x121   : > { %v3563_v5 = vpop.permute.xlu0 %903  ;;  %v3565_v11 = vpop.permute.xlu1 %908  ;;  %v3608_v0 = vsel %vm1448_vm11, 1, %v4442_v25  ;;  %v457_v3 = vadd.f32 %v448_v15, %v374_v45  ;;  %v458_v7 = vadd.f32 %v449_v8, %v375_v10  ;;  %v2337_v35 = vld [vmem:[%s3488_s9 + $0xa0] sm:$0xff]  ;;  %v3615_v43 = vsel %vm1449_vm12, 1, %v4442_v25  ;;  %v2338_v45 = vld [vmem:[%s3488_s9 + $0xa8] sm:$0xff]  ;;  %v2527_v8 = vld [vmem:[%s4408_s4 + $0xf0] sm:$0xff] }
 0x122   : > { %1399 = vperm.xlu0 %2750, %v1373_v17   ;;  %1469 = vperm.xlu1 %2751, %v2524_v16   ;;  %v380_v16 = vadd.f32 %v3185_v31, %v326_v44  ;;  %v2520_v17 = vld [vmem:[%s4407_s3 + $0x100] sm:$0xff]  ;;  %v2325_v44 = vld [vmem:[%s3488_s9 + $0x88] sm:$0xff]  ;;  %vm1452_vm15 = vcmp.gt.f32.partialorder %v2519_v26, 0.5  ;;  %v452_v6 = vmul.f32 %v2321_v36, %v3223_v46  ;;  %v453_v37 = vmul.f32 %v2322_v53, %v3225_v47  ;;  %v2528_v10 = vld [vmem:[%s4408_s4 + $0xf8] sm:$0xff] }
 0x123   : > { %v2324_v31 = vld [vmem:[%s3488_s9 + $0x80] sm:$0xff]  ;;  %v3628_v4 = vsel %vm1450_vm13, 1, %v4442_v25  ;;  %vm1453_vm0 = vcmp.gt.f32.partialorder %v2520_v17, 0.5  ;;  %v459_v15 = vadd.f32 %v450_v30, %v376_v52  ;;  %v454_v46 = vmul.f32 %v2323_v1, %v3233_v50  ;;  %v2339_v18 = vld [vmem:[%s3488_s9 + $0xb0] sm:$0xff] }
 0x124   : > { %v455_v47 = vmul.f32 %v2324_v31, %v3235_v51  ;;  %v460_v36 = vadd.f32 %v451_v28, %v377_v22  ;;  %v456_v53 = vmul.f32 %v2325_v44, %v3249_v56  ;;  %v531_v14 = vmul.f32 %v2335_v20, %v3251_v57  ;;  %v2343_v28 = vld [vmem:[%s3488_s9 + $0xd0] sm:$0xff]  ;;  %v2353_v56 = vld [vmem:[%s3488_s9 + $0xd8] sm:$0xff]  ;;  %v2354_v17 = vld [vmem:[%s3488_s9 + $0xe0] sm:$0xff] }
 0x125   : > { %v3602_v34 = vpop.permute.xlu0 %913  ;;  %v3604_v42 = vpop.permute.xlu1 %918  ;;  %v3648_v51 = vsel %vm1452_vm15, 1, %v4442_v25  ;;  %v532_v30 = vmul.f32 %v2336_v58, %v3261_v62  ;;  %v533_v19 = vmul.f32 %v2337_v35, %v3263_v63  ;;  %v534_v22 = vmul.f32 %v2338_v45, %v3273_v9  ;;  %v2529_v63 = vld [vmem:[%s4408_s4 + $0x100] sm:$0xff]  ;;  %v2530_v9 = vld [vmem:[%s4408_s4 + $0x108] sm:$0xff]  ;;  %v2356_v20 = vld [vmem:[%s3488_s9 + $0xf0] sm:$0xff] }
 0x126   : > { %4460 = vst [vmem:[#allocation41_spill] sm:$0xff] %v3604_v42  ;;  %1474 = vperm.xlu0 %2750, %v2525_v38   ;;  %1479 = vperm.xlu1 %2751, %v2526_v39   ;;  %v2340_v38 = vld [vmem:[%s3488_s9 + $0xb8] sm:$0xff]  ;;  %v3636_v39 = vsel %vm1451_vm14, 1, %v4442_v25  ;;  %v2342_v42 = vld [vmem:[%s3488_s9 + $0xc8] sm:$0xff]  ;;  %v3657_v57 = vsel %vm1453_vm0, 1, %v4442_v25  ;;  %v461_v26 = vadd.f32 %v452_v6, %v378_v29  ;;  %v462_v1 = vadd.f32 %v453_v37, %v379_v23 }
 0x127   : > { %v535_v31 = vmul.f32 %v2339_v18, %v3275_v12  ;;  %v536_v62 = vmul.f32 %v2340_v38, %v3285_v21  ;;  %v3670_v58 = vld [vmem:[%s4407_s3 + $0x108] sm:$0xff]  ;;  %v463_v29 = vadd.f32 %v454_v46, %v380_v16  ;;  %v464_v12 = vadd.f32 %v455_v47, %v381_v27  ;;  %v2360_v46 = vld [vmem:[%s3488_s9 + $0x110] sm:$0xff]  ;;  %v2361_v47 = vld [vmem:[%s3488_s9 + $0x118] sm:$0xff] }
 0x128   : > { %v537_v23 = vmul.f32 %v2341_v59, %v3287_v24  ;;  %v538_v21 = vmul.f32 %v2342_v42, %v3294_v32  ;;  %v2355_v44 = vld [vmem:[%s3488_s9 + $0xe8] sm:$0xff]  ;;  %v465_v35 = vadd.f32 %v456_v53, %v382_v2  ;;  %v540_v6 = vadd.f32 %v531_v14, %v457_v3  ;;  %v2371_v18 = vld [vmem:[%s3488_s9 + $0x120] sm:$0xff]  ;;  %v3701_v38 = vld [vmem:[%s4407_s3 + $0x110] sm:$0xff] }
 0x129   : > { %v3642_v52 = vpop.permute.xlu0 %923  ;;  %v3644_v50 = vpop.permute.xlu1 %928  ;;  %v539_v37 = vmul.f32 %v2343_v28, %v3296_v33  ;;  %v614_v45 = vmul.f32 %v2353_v56, %v3302_v40  ;;  %v2359_v16 = vld [vmem:[%s3488_s9 + $0x108] sm:$0xff]  ;;  %v541_v32 = vadd.f32 %v532_v30, %v458_v7  ;;  %v542_v59 = vadd.f32 %v533_v19, %v459_v15  ;;  %v2531_v7 = vld [vmem:[%s4408_s4 + $0x110] sm:$0xff]  ;;  %v2532_v15 = vld [vmem:[%s4408_s4 + $0x118] sm:$0xff] }
 0x12a   : > { %1484 = vperm.xlu0 %2750, %v2527_v8   ;;  %1489 = vperm.xlu1 %2751, %v2528_v10   ;;  %v2357_v8 = vld [vmem:[%s3488_s9 + $0xf8] sm:$0xff]  ;;  %v2358_v10 = vld [vmem:[%s3488_s9 + $0x100] sm:$0xff]  ;;  %v543_v42 = vadd.f32 %v534_v22, %v460_v36  ;;  %vm1454_vm1 = vcmp.gt.f32.partialorder %v3670_v58, 0.5  ;;  %v544_v33 = vadd.f32 %v535_v31, %v461_v26  ;;  %v545_v40 = vadd.f32 %v536_v62, %v462_v1  ;;  %v2372_v14 = vld [vmem:[%s3488_s9 + $0x128] sm:$0xff] }
 0x12b   : > { %v615_v2 = vmul.f32 %v2354_v17, %v3304_v41  ;;  %v616_v3 = vmul.f32 %v2355_v44, %v3312_v48  ;;  %v546_v36 = vadd.f32 %v537_v23, %v463_v29  ;;  %v547_v53 = vadd.f32 %v538_v21, %v464_v12  ;;  %v2373_v30 = vld [vmem:[%s3488_s9 + $0x130] sm:$0xff]  ;;  %v2374_v26 = vld [vmem:[%s3488_s9 + $0x138] sm:$0xff]  ;;  %v2375_v1 = vld [vmem:[%s3488_s9 + $0x140] sm:$0xff] }
 0x12c   : > { %v617_v41 = vmul.f32 %v2356_v20, %v3314_v49  ;;  %v618_v48 = vmul.f32 %v2357_v8, %v3322_v54  ;;  %v548_v19 = vadd.f32 %v539_v37, %v465_v35  ;;  %v623_v22 = vadd.f32 %v614_v45, %v540_v6  ;;  %v4461_v54 = vld [vmem:[#allocation5_spill] sm:$0xff]  ;;  %v2376_v29 = vld [vmem:[%s3488_s9 + $0x148] sm:$0xff]  ;;  %v2377_v12 = vld [vmem:[%s3488_s9 + $0x150] sm:$0xff] }
 0x12d   : > { %v3682_v27 = vpop.permute.xlu0 %933  ;;  %v3684_v24 = vpop.permute.xlu1 %938  ;;  %v619_v28 = vmul.f32 %v2358_v10, %v3324_v55  ;;  %v620_v56 = vmul.f32 %v2359_v16, %v3332_v60  ;;  %v622_v49 = vmul.f32 %v2361_v47, %v3348_v13  ;;  %vm1455_vm2 = vcmp.gt.f32.partialorder %v3701_v38, 0.5  ;;  %v4462_v23 = vld [vmem:[#allocation6_spill] sm:$0xff]  ;;  %v4463_v17 = vld [vmem:[#allocation7_spill] sm:$0xff]  ;;  %v4464_v13 = vld [vmem:[#allocation8_spill] sm:$0xff] }
 0x12e   : > { %1494 = vperm.xlu0 %2750, %v2529_v63   ;;  %1499 = vperm.xlu1 %2751, %v2530_v9   ;;  %v621_v63 = vmul.f32 %v2360_v46, %v3334_v61  ;;  %v697_v9 = vmul.f32 %v2371_v18, %v4461_v54  ;;  %v624_v55 = vadd.f32 %v615_v2, %v541_v32  ;;  %v4465_v6 = vld [vmem:[#allocation9_spill] sm:$0xff]  ;;  %v2389_v45 = vld [vmem:[%s3488_s9 + $0x168] sm:$0xff]  ;;  %v2390_v8 = vld [vmem:[%s3488_s9 + $0x170] sm:$0xff] }
 0x12f   : > { %v625_v60 = vadd.f32 %v616_v3, %v542_v59  ;;  %v698_v21 = vmul.f32 %v2372_v14, %v4462_v23  ;;  %v699_v61 = vmul.f32 %v2373_v30, %v4463_v17  ;;  %v626_v44 = vadd.f32 %v617_v41, %v543_v42  ;;  %v4466_v46 = vld [vmem:[#allocation10_spill] sm:$0xff]  ;;  %v4467_v32 = vld [vmem:[#allocation11_spill] sm:$0xff]  ;;  %v2391_v18 = vld [vmem:[%s3488_s9 + $0x178] sm:$0xff] }
 0x130   : > { %v627_v20 = vadd.f32 %v618_v48, %v544_v33  ;;  %v700_v35 = vmul.f32 %v2374_v26, %v4464_v13  ;;  %v701_v37 = vmul.f32 %v2375_v1, %v4465_v6  ;;  %v628_v10 = vadd.f32 %v619_v28, %v545_v40  ;;  %v2392_v2 = vld [vmem:[%s3488_s9 + $0x180] sm:$0xff]  ;;  %v2407_v40 = vld [vmem:[%s3488_s9 + $0x1b0] sm:$0xff]  ;;  %v2378_v14 = vld [vmem:[%s3488_s9 + $0x158] sm:$0xff] }
 0x131   : > { %v3711_v31 = vpop.permute.xlu0 %943  ;;  %v3713_v62 = vpop.permute.xlu1 %1002  ;;  %v629_v16 = vadd.f32 %v620_v56, %v546_v36  ;;  %v702_v47 = vmul.f32 %v2376_v29, %v4466_v46  ;;  %v703_v59 = vmul.f32 %v2377_v12, %v4467_v32  ;;  %v3735_v3 = vadd.f32 %v621_v63, %v547_v53  ;;  %v2408_v36 = vld [vmem:[%s3488_s9 + $0x1b8] sm:$0xff]  ;;  %v2379_v30 = vld [vmem:[%s3488_s9 + $0x160] sm:$0xff]  ;;  %v4469_v28 = vld [vmem:[#allocation15_spill] sm:$0xff] }
 0x132   : > { %1504 = vperm.xlu0 %2750, %v2531_v7   ;;  %1509 = vperm.xlu1 %2751, %v2532_v15   ;;  %v3737_v7 = vadd.f32 %v622_v49, %v548_v19  ;;  %v706_v15 = vadd.f32 %v697_v9, %v623_v22  ;;  %v3746_v41 = vsel %vm1454_vm1, 1, %v4442_v25  ;;  %v707_v48 = vadd.f32 %v698_v21, %v624_v55  ;;  %v4468_v19 = vld [vmem:[#allocation14_spill] sm:$0xff]  ;;  %v2409_v26 = vld [vmem:[%s3488_s9 + $0x1c0] sm:$0xff]  ;;  %v4470_v63 = vld [vmem:[#allocation16_spill] sm:$0xff] }
 0x133   : > { %v708_v53 = vadd.f32 %v699_v61, %v625_v60  ;;  %v780_v22 = vmul.f32 %v2389_v45, %v4468_v19  ;;  %v781_v56 = vmul.f32 %v2390_v8, %v4469_v28  ;;  %v709_v1 = vadd.f32 %v700_v35, %v626_v44  ;;  %v4471_v49 = vld [vmem:[#allocation17_spill] sm:$0xff]  ;;  %v2425_v54 = vld [vmem:[%s3488_s9 + $0x1f8] sm:$0xff]  ;;  %v2393_v55 = vld [vmem:[%s3488_s9 + $0x188] sm:$0xff] }
 0x134   : > { %v783_v58 = vmul.f32 %v2392_v2, %v4471_v49  ;;  %v2426_v9 = vld [vmem:[%s3488_s9 + $0x200] sm:$0xff]  ;;  %v711_v29 = vadd.f32 %v702_v47, %v628_v10  ;;  %v712_v12 = vadd.f32 %v703_v59, %v629_v16  ;;  %v2394_v60 = vld [vmem:[%s3488_s9 + $0x190] sm:$0xff]  ;;  %v4473_v17 = vld [vmem:[#allocation24_spill] sm:$0xff]  ;;  %v1528_v46 = vsel %vm1455_vm2, 1, %v4442_v25 }
 0x135   : > { %v3731_v42 = vpop.permute.xlu0 %1007  ;;  %v3733_v33 = vpop.permute.xlu1 %1012  ;;  %v4472_v23 = vld [vmem:[#allocation23_spill] sm:$0xff]  ;;  %v864_v61 = vmul.f32 %v2408_v36, %v4473_v17  ;;  %v4474_v13 = vld [vmem:[#allocation12_spill] sm:$0xff]  ;;  %v4475_v6 = vld [vmem:[#allocation13_spill] sm:$0xff]  ;;  %v789_v47 = vadd.f32 %v780_v22, %v706_v15  ;;  %v790_v32 = vadd.f32 %v781_v56, %v707_v48  ;;  %v946_v2 = vmul.f32 %v2425_v54, %v3563_v5 }
 0x136   : > { %1531 = vperm.xlu0 %2750, %v3608_v0   ;;  %1534 = vperm.xlu1 %2751, %v3615_v43   ;;  %v710_v0 = vadd.f32 %v701_v37, %v627_v20  ;;  %v782_v43 = vmul.f32 %v2391_v18, %v4470_v63  ;;  %v863_v21 = vmul.f32 %v2407_v40, %v4472_v23  ;;  %v4476_v45 = vld [vmem:[#allocation25_spill] sm:$0xff]  ;;  %v2410_v10 = vld [vmem:[%s3488_s9 + $0x1c8] sm:$0xff]  ;;  %v2395_v59 = vld [vmem:[%s3488_s9 + $0x198] sm:$0xff] }
 0x137   : > { %v704_v35 = vmul.f32 %v2378_v14, %v4474_v13  ;;  %v705_v37 = vmul.f32 %v2379_v30, %v4475_v6  ;;  %v865_v8 = vmul.f32 %v2409_v26, %v4476_v45  ;;  %v2427_v16 = vld [vmem:[%s3488_s9 + $0x208] sm:$0xff]  ;;  %v2396_v18 = vld [vmem:[%s3488_s9 + $0x1a0] sm:$0xff]  ;;  %v947_v40 = vmul.f32 %v2426_v9, %v3565_v11  ;;  %v2523_v36 = vld [vmem:[%s4407_s3 + $0x118] sm:$0xff] }
 0x138   : > { %v4477_v14 = vld [vmem:[#allocation18_spill] sm:$0xff]  ;;  %v4478_v38 = vld [vmem:[#allocation19_spill] sm:$0xff]  ;;  %v872_v22 = vadd.f32 %v863_v21, %v789_v47  ;;  %v873_v28 = vadd.f32 %v864_v61, %v790_v32  ;;  %v2412_v26 = vld [vmem:[%s3488_s9 + $0x1d8] sm:$0xff]  ;;  %v948_v11 = vmul.f32 %v2427_v16, %v3602_v34  ;;  %vm1456_vm3 = vcmp.gt.f32.partialorder %v2523_v36, 0.5 }
 0x139   : > { %v3761_v44 = vpop.permute.xlu0 %1017  ;;  %v3763_v20 = vpop.permute.xlu1 %1022  ;;  %v784_v30 = vmul.f32 %v2393_v55, %v4477_v14  ;;  %v785_v19 = vmul.f32 %v2394_v60, %v4478_v38  ;;  %v2411_v15 = vld [vmem:[%s3488_s9 + $0x1d0] sm:$0xff]  ;;  %v4479_v56 = vld [vmem:[#allocation26_spill] sm:$0xff]  ;;  %v4481_v49 = vld [vmem:[#allocation21_spill] sm:$0xff]  ;;  %v713_v13 = vadd.f32 %v704_v35, %v3735_v3  ;;  %v714_v6 = vadd.f32 %v705_v37, %v3737_v7 }
 0x13a   : > { %1537 = vperm.xlu0 %2750, %v3628_v4   ;;  %1540 = vperm.xlu1 %2751, %v3636_v39   ;;  %v791_v4 = vadd.f32 %v782_v43, %v708_v53  ;;  %v792_v39 = vadd.f32 %v783_v58, %v709_v1  ;;  %v2428_v48 = vld [vmem:[%s3488_s9 + $0x210] sm:$0xff]  ;;  %v866_v5 = vmul.f32 %v2410_v10, %v4479_v56  ;;  %v4480_v1 = vld [vmem:[#allocation20_spill] sm:$0xff]  ;;  %v4483_v21 = vld [vmem:[#allocation41_spill] sm:$0xff] }
 0x13b   : > { %v786_v43 = vmul.f32 %v2395_v59, %v4480_v1  ;;  %v787_v58 = vmul.f32 %v2396_v18, %v4481_v49  ;;  %v2429_v9 = vld [vmem:[%s3488_s9 + $0x218] sm:$0xff]  ;;  %v4482_v34 = vld [vmem:[#allocation27_spill] sm:$0xff]  ;;  %v955_v60 = vadd.f32 %v946_v2, %v872_v22  ;;  %v956_v23 = vadd.f32 %v947_v40, %v873_v28  ;;  %v2430_v61 = vld [vmem:[%s3488_s9 + $0x220] sm:$0xff] }
 0x13c   : > { %v874_v54 = vadd.f32 %v865_v8, %v791_v4  ;;  %v867_v55 = vmul.f32 %v2411_v15, %v4482_v34  ;;  %v949_v17 = vmul.f32 %v2428_v48, %v4483_v21  ;;  %v793_v45 = vadd.f32 %v784_v30, %v710_v0  ;;  %v2413_v47 = vld [vmem:[%s3488_s9 + $0x1e0] sm:$0xff]  ;;  %v2414_v32 = vld [vmem:[%s3488_s9 + $0x1e8] sm:$0xff]  ;;  %v2432_v36 = vld [vmem:[%s3488_s9 + $0x230] sm:$0xff] }
 0x13d   : > { %v3789_v63 = vpop.permute.xlu0 %1027  ;;  %v3791_v53 = vpop.permute.xlu1 %1032  ;;  %v794_v10 = vadd.f32 %v785_v19, %v711_v29  ;;  %v875_v16 = vadd.f32 %v866_v5, %v792_v39  ;;  %v950_v18 = vmul.f32 %v2429_v9, %v3642_v52  ;;  %v795_v3 = vadd.f32 %v786_v43, %v712_v12  ;;  %v2431_v39 = vld [vmem:[%s3488_s9 + $0x228] sm:$0xff]  ;;  %v2560_v12 = vld [vmem:[%s4408_s4 + $0x120] sm:$0xff]  ;;  %v2415_v15 = vld [vmem:[%s3488_s9 + $0x1f0] sm:$0xff] }
 0x13e   : > { %1543 = vperm.xlu0 %2750, %v3648_v51   ;;  %1546 = vperm.xlu1 %2751, %v3657_v57   ;;  %v4484_v51 = vld [vmem:[#allocation28_spill] sm:$0xff]  ;;  %v2397_v57 = vld [vmem:[%s3488_s9 + $0x1a8] sm:$0xff]  ;;  %v957_v59 = vadd.f32 %v948_v11, %v874_v54  ;;  %v796_v7 = vadd.f32 %v787_v58, %v713_v13  ;;  %v951_v0 = vmul.f32 %v2430_v61, %v3644_v50  ;;  %v1529_v29 = vsel %vm1456_vm3, 1, %v4442_v25  ;;  %v4486_v38 = vld [vmem:[#allocation29_spill] sm:$0xff] }
 0x13f   : > { %v868_v8 = vmul.f32 %v2412_v26, %v4484_v51  ;;  %v876_v52 = vadd.f32 %v867_v55, %v793_v45  ;;  %v3821_v35 = vmax.f32 %v955_v60, 0.0  ;;  %v3823_v37 = vmax.f32 %v956_v23, 0.0  ;;  %v4485_v14 = vld [vmem:[#allocation22_spill] sm:$0xff]  ;;  %v4488_v58 = vld [vmem:[#allocation31_spill] sm:$0xff]  ;;  %v4489_v54 = vld [vmem:[#allocation33_spill] sm:$0xff] }
 0x140   : > { %v958_v4 = vadd.f32 %v949_v17, %v875_v16  ;;  %v788_v30 = vmul.f32 %v2397_v57, %v4485_v14  ;;  %v3834_v48 = vmax.f32 %v957_v59, 0.0  ;;  %v952_v1 = vmul.f32 %v2431_v39, %v3682_v27  ;;  %v2562_v27 = vld [vmem:[%s4408_s4 + $0x130] sm:$0xff]  ;;  %v4490_v60 = vld [vmem:[#allocation38_spill] sm:$0xff]  ;;  %v2433_v21 = vld [vmem:[%s3488_s9 + $0x238] sm:$0xff] }
 0x141   : > { %v3809_v2 = vpop.permute.xlu0 %1037  ;;  %v3811_v40 = vpop.permute.xlu1 %1042  ;;  %v877_v50 = vadd.f32 %v868_v8, %v794_v10  ;;  %v959_v22 = vadd.f32 %v950_v18, %v876_v52  ;;  %v1045_v28 = vmul.f32 %v3713_v62, %v3821_v35  ;;  %v1046_v56 = vmul.f32 %v3731_v42, %v3823_v37  ;;  %v2561_v42 = vld [vmem:[%s4408_s4 + $0x128] sm:$0xff]  ;;  %v2564_v59 = vld [vmem:[%s4408_s4 + $0x140] sm:$0xff]  ;;  %v4493_v39 = vld [vmem:[#allocation35_spill] sm:$0xff] }
 0x142   : > { %1549 = vperm.xlu0 %2750, %v3746_v41   ;;  %1552 = vperm.xlu1 %2751, %v1528_v46   ;;  %v869_v41 = vmul.f32 %v2413_v47, %v4486_v38  ;;  %v4487_v46 = vld [vmem:[#allocation37_spill] sm:$0xff]  ;;  %v3841_v43 = vmax.f32 %v958_v4, 0.0  ;;  %v953_v49 = vmul.f32 %v2432_v36, %v3684_v24  ;;  %v797_v34 = vadd.f32 %v788_v30, %v714_v6  ;;  %v4491_v16 = vld [vmem:[#allocation30_spill] sm:$0xff] }
 0x143   : > { %v870_v19 = vmul.f32 %v2414_v32, %v4487_v46  ;;  %v960_v11 = vadd.f32 %v951_v0, %v877_v50  ;;  %v871_v23 = vmul.f32 %v2415_v15, %v4490_v60  ;;  %v3859_v17 = vmax.f32 %v959_v22, 0.0  ;;  %v4494_v14 = vld [vmem:[#allocation34_spill] sm:$0xff] }
 0x144   : > { %v878_v55 = vadd.f32 %v869_v41, %v795_v3  ;;  %v1047_v61 = vmul.f32 %v3733_v33, %v3834_v48  ;;  %v1048_v13 = vmul.f32 %v3761_v44, %v3841_v43  ;;  %v954_v57 = vmul.f32 %v2433_v21, %v3711_v31  ;;  %v4492_v33 = vld [vmem:[#allocation32_spill] sm:$0xff]  ;;  %v2552_v36 = vld [vmem:[%s4407_s3 + $0x128] sm:$0xff] }
 0x145   : > { %v1065_v5 = vpop.permute.xlu0 %1064  ;;  %v1068_v26 = vpop.permute.xlu1 %1067  ;;  %v879_v24 = vadd.f32 %v870_v19, %v796_v7  ;;  %v3865_v51 = vmax.f32 %v960_v11, 0.0  ;;  %v2563_v44 = vld [vmem:[%s4408_s4 + $0x138] sm:$0xff]  ;;  %v880_v18 = vadd.f32 %v871_v23, %v797_v34  ;;  %v1049_v3 = vmul.f32 %v3763_v20, %v3859_v17  ;;  %v2565_v20 = vld [vmem:[%s4408_s4 + $0x148] sm:$0xff]  ;;  %v2551_v19 = vld [vmem:[%s4407_s3 + $0x120] sm:$0xff] }
 0x146   : > { %vm1090_vm4 = vcmp.eq.s32.totalorder %v1065_v5, 1  ;;  %vm1091_vm5 = vcmp.eq.s32.totalorder %v1068_v26, 1  ;;  %1555 = vperm.xlu0 %2750, %v1529_v29   ;;  %1625 = vperm.xlu1 %2751, %v2560_v12   ;;  %v961_v8 = vadd.f32 %v952_v1, %v878_v55  ;;  %v2568_v5 = vld [vmem:[%s4408_s4 + $0x160] sm:$0xff]  ;;  %vm1604_vm12 = vcmp.gt.f32.partialorder %v2551_v19, 0.5  ;;  %v2556_v55 = vld [vmem:[%s4407_s3 + $0x148] sm:$0xff] }
 0x147   : > { %v1099_v62 = vsel %vm1090_vm4, %v4488_v58, %v1045_v28  ;;  %v1100_v9 = vsel %vm1091_vm5, %v4489_v54, %v1046_v56  ;;  %v962_v10 = vadd.f32 %v953_v49, %v879_v24  ;;  %v1050_v31 = vmul.f32 %v3789_v63, %v3865_v51  ;;  %v2566_v63 = vld [vmem:[%s4408_s4 + $0x150] sm:$0xff]  ;;  %v4496_v28 = vld [vmem:[#allocation36_spill] sm:$0xff]  ;;  %v2555_v34 = vld [vmem:[%s4407_s3 + $0x140] sm:$0xff] }
 0x148   : > { %1108 = vst [vmem:[%s3855_s14] sm:$0xff] %v1099_v62  ;;  %1109 = vst [vmem:[%s3855_s14 + $0x8] sm:$0xff] %v1100_v9  ;;  %v3882_v29 = vmax.f32 %v961_v8, 0.0  ;;  %v963_v4 = vadd.f32 %v954_v57, %v880_v18  ;;  %v2567_v56 = vld [vmem:[%s4408_s4 + $0x158] sm:$0xff]  ;;  %vm1605_vm13 = vcmp.gt.f32.partialorder %v2552_v36, 0.5  ;;  %v2553_v49 = vld [vmem:[%s4407_s3 + $0x130] sm:$0xff]  ;;  %v1677_v9 = vsel %vm1604_vm12, 1, %v4442_v25 }
 0x149   : > { %v1071_v6 = vpop.permute.xlu0 %1070  ;;  %v1074_v45 = vpop.permute.xlu1 %1073  ;;  %v3884_v52 = vmax.f32 %v962_v10, 0.0  ;;  %v2554_v58 = vld [vmem:[%s4407_s3 + $0x138] sm:$0xff]  ;;  %vm1606_vm15 = vcmp.gt.f32.partialorder %v2553_v49, 0.5  ;;  %vm1608_vm1 = vcmp.gt.f32.partialorder %v2555_v34, 0.5  ;;  %vm1609_vm2 = vcmp.gt.f32.partialorder %v2556_v55, 0.5  ;;  %v2559_v57 = vld [vmem:[%s4407_s3 + $0x160] sm:$0xff] }
 0x14a   : > { %vm1092_vm6 = vcmp.eq.s32.totalorder %v1071_v6, 1  ;;  %vm1093_vm7 = vcmp.eq.s32.totalorder %v1074_v45, 1  ;;  %1630 = vperm.xlu0 %2750, %v2561_v42   ;;  %1635 = vperm.xlu1 %2751, %v2562_v27   ;;  %v1051_v50 = vmul.f32 %v3791_v53, %v3882_v29  ;;  %v3906_v15 = vmax.f32 %v963_v4, 0.0  ;;  %v4495_v53 = vld [vmem:[#allocation39_spill] sm:$0xff]  ;;  %v4497_v62 = vld [vmem:[#allocation40_spill] sm:$0xff]  ;;  %v2434_v18 = vld [vmem:[%s3488_s9 + $0x48] sm:$0xff] }
 0x14b   : > { %v1101_v47 = vsel %vm1092_vm6, %v4491_v16, %v1047_v61  ;;  %v1102_v32 = vsel %vm1093_vm7, %v4492_v33, %v1048_v13  ;;  %v1052_v38 = vmul.f32 %v3809_v2, %v3884_v52  ;;  %v1678_v42 = vsel %vm1605_vm13, 1, %v4442_v25  ;;  %v2557_v61 = vld [vmem:[%s4407_s3 + $0x150] sm:$0xff]  ;;  %v2558_v13 = vld [vmem:[%s4407_s3 + $0x158] sm:$0xff]  ;;  %v2587_v55 = vld [vmem:[%s4407_s3 + $0x168] sm:$0xff] }
 0x14c   : > { %1110 = vst [vmem:[%s3855_s14 + $0x10] sm:$0xff] %v1101_v47  ;;  %1111 = vst [vmem:[%s3855_s14 + $0x18] sm:$0xff] %v1102_v32  ;;  %v1053_v26 = vmul.f32 %v3811_v40, %v3906_v15  ;;  %vm1607_vm0 = vcmp.gt.f32.partialorder %v2554_v58, 0.5  ;;  %v1679_v60 = vsel %vm1606_vm15, 1, %v4442_v25  ;;  %v1681_v6 = vsel %vm1608_vm1, 1, %v4442_v25  ;;  %v2601_v58 = vld [vmem:[%s4408_s4 + $0x190] sm:$0xff] }
 0x14d   : > { %v1077_v7 = vpop.permute.xlu0 %1076  ;;  %v1080_v0 = vpop.permute.xlu1 %1079  ;;  %v1680_v23 = vsel %vm1607_vm0, 1, %v4442_v25  ;;  %v1682_v45 = vsel %vm1609_vm2, 1, %v4442_v25  ;;  %vm1610_vm3 = vcmp.gt.f32.partialorder %v2557_v61, 0.5  ;;  %vm1611_vm4 = vcmp.gt.f32.partialorder %v2558_v13, 0.5  ;;  %v2604_v61 = vld [vmem:[%s4408_s4 + $0x1a8] sm:$0xff] }
 0x14e   : > { %vm1094_vm8 = vcmp.eq.s32.totalorder %v1077_v7, 1  ;;  %vm1095_vm9 = vcmp.eq.s32.totalorder %v1080_v0, 1  ;;  %1640 = vperm.xlu0 %2750, %v2563_v44   ;;  %1645 = vperm.xlu1 %2751, %v2564_v59   ;;  %v1683_v16 = vsel %vm1610_vm3, 1, %v4442_v25  ;;  %v1684_v47 = vsel %vm1611_vm4, 1, %v4442_v25  ;;  %v2596_v59 = vld [vmem:[%s4408_s4 + $0x168] sm:$0xff] }
 0x14f   : > { %v1103_v12 = vsel %vm1094_vm8, %v4493_v39, %v1049_v3  ;;  %v1104_v30 = vsel %vm1095_vm9, %v4494_v14, %v1050_v31  ;;  %vm1612_vm5 = vcmp.gt.f32.partialorder %v2559_v57, 0.5  ;;  %v2435_v3 = vld [vmem:[%s3488_s9 + $0x50] sm:$0xff]  ;;  %v2442_v13 = vld [vmem:[%s3488_s9 + $0x88] sm:$0xff]  ;;  %v2590_v57 = vld [vmem:[%s4407_s3 + $0x180] sm:$0xff] }
 0x150   : > { %1112 = vst [vmem:[%s3855_s14 + $0x20] sm:$0xff] %v1103_v12  ;;  %1113 = vst [vmem:[%s3855_s14 + $0x28] sm:$0xff] %v1104_v30  ;;  %v1685_v44 = vsel %vm1612_vm5, 1, %v4442_v25  ;;  %v2597_v14 = vld [vmem:[%s4408_s4 + $0x170] sm:$0xff]  ;;  %v2598_v30 = vld [vmem:[%s4408_s4 + $0x178] sm:$0xff]  ;;  %vm1763_vm2 = vcmp.gt.f32.partialorder %v2590_v57, 0.5 }
 0x151   : > { %v1083_v41 = vpop.permute.xlu0 %1082  ;;  %v1086_v46 = vpop.permute.xlu1 %1085  ;;  %v2638_v57 = vld [vmem:[%s4408_s4 + $0x1e0] sm:$0xff] }
 0x152   : > { %vm1096_vm10 = vcmp.eq.s32.totalorder %v1083_v41, 1  ;;  %vm1097_vm11 = vcmp.eq.s32.totalorder %v1086_v46, 1  ;;  %1650 = vperm.xlu0 %2750, %v2565_v20   ;;  %1655 = vperm.xlu1 %2751, %v2566_v63   ;;  %v2436_v20 = vld [vmem:[%s3488_s9 + $0x58] sm:$0xff]  ;;  %v2437_v63 = vld [vmem:[%s3488_s9 + $0x60] sm:$0xff] }
 0x153   : > { %v1105_v22 = vsel %vm1096_vm10, %v4495_v53, %v1051_v50  ;;  %v1106_v2 = vsel %vm1097_vm11, %v4496_v28, %v1052_v38  ;;  %v2599_v53 = vld [vmem:[%s4408_s4 + $0x180] sm:$0xff]  ;;  %v2438_v28 = vld [vmem:[%s3488_s9 + $0x68] sm:$0xff] }
 0x154   : > { %1114 = vst [vmem:[%s3855_s14 + $0x30] sm:$0xff] %v1105_v22  ;;  %1115 = vst [vmem:[%s3855_s14 + $0x38] sm:$0xff] %v1106_v2  ;;  %v2600_v22 = vld [vmem:[%s4408_s4 + $0x188] sm:$0xff]  ;;  %v2439_v2 = vld [vmem:[%s3488_s9 + $0x70] sm:$0xff] }
 0x155   : > { %v1089_v11 = vpop.permute.xlu0 %1088  ;;  %v1158_v1 = vpop.permute.xlu1 %1157 }
 0x156   : > { %vm1098_vm14 = vcmp.eq.s32.totalorder %v1089_v11, 1  ;;  %1660 = vperm.xlu0 %2750, %v2567_v56   ;;  %1665 = vperm.xlu1 %2751, %v2568_v5   ;;  %v1200_v31 = vmul.f32 %v1158_v1, %v3821_v35 }
 0x157   : > { %v1107_v54 = vsel %vm1098_vm14, %v4497_v62, %v1053_v26  ;;  %v2602_v62 = vld [vmem:[%s4408_s4 + $0x198] sm:$0xff]  ;;  %vm1760_vm14 = vcmp.gt.f32.partialorder %v2587_v55, 0.5  ;;  %v2635_v55 = vld [vmem:[%s4408_s4 + $0x1c8] sm:$0xff] }
 0x158   : > { %1116 = vst [vmem:[%s3855_s14 + $0x40] sm:$0xff] %v1107_v54  ;;  %v2440_v54 = vld [vmem:[%s3488_s9 + $0x78] sm:$0xff] }
 0x159   : > { %v1163_v40 = vpop.permute.xlu0 %1162  ;;  %v1168_v27 = vpop.permute.xlu1 %1167 }
 0x15a   : > { %1687 = vperm.xlu0 %2750, %v1677_v9   ;;  %1690 = vperm.xlu1 %2751, %v1678_v42   ;;  %v1201_v7 = vmul.f32 %v1163_v40, %v3823_v37  ;;  %v1202_v50 = vmul.f32 %v1168_v27, %v3834_v48  ;;  %v2441_v9 = vld [vmem:[%s3488_s9 + $0x80] sm:$0xff] }
 0x15d   : > { %v1173_v21 = vpop.permute.xlu0 %1172  ;;  %v1178_v24 = vpop.permute.xlu1 %1177 }
 0x15e   : > { %1693 = vperm.xlu0 %2750, %v1679_v60   ;;  %1696 = vperm.xlu1 %2751, %v1680_v23   ;;  %v1203_v38 = vmul.f32 %v1173_v21, %v3841_v43  ;;  %v1204_v56 = vmul.f32 %v1178_v24, %v3859_v17  ;;  %v2588_v60 = vld [vmem:[%s4407_s3 + $0x170] sm:$0xff]  ;;  %v2603_v24 = vld [vmem:[%s4408_s4 + $0x1a0] sm:$0xff] }
 0x15f   : > { %vm1761_vm15 = vcmp.gt.f32.partialorder %v2588_v60, 0.5  ;;  %v2636_v60 = vld [vmem:[%s4408_s4 + $0x1d0] sm:$0xff] }
 0x161   : > { %v1183_v8 = vpop.permute.xlu0 %1182  ;;  %v3946_v10 = vpop.permute.xlu1 %1187 }
 0x162   : > { %1699 = vperm.xlu0 %2750, %v1681_v6   ;;  %1702 = vperm.xlu1 %2751, %v1682_v45   ;;  %v1205_v5 = vmul.f32 %v1183_v8, %v3865_v51  ;;  %v1206_v42 = vmul.f32 %v3946_v10, %v3882_v29  ;;  %v2589_v10 = vld [vmem:[%s4407_s3 + $0x178] sm:$0xff] }
 0x163   : > { %vm1762_vm1 = vcmp.gt.f32.partialorder %v2589_v10, 0.5  ;;  %v2637_v10 = vld [vmem:[%s4408_s4 + $0x1d8] sm:$0xff] }
 0x165   : > { %v1193_v33 = vpop.permute.xlu0 %1192  ;;  %v3953_v32 = vpop.permute.xlu1 %1197 }
 0x166   : > { %1705 = vperm.xlu0 %2750, %v1683_v16   ;;  %1708 = vperm.xlu1 %2751, %v1684_v47   ;;  %v1207_v40 = vmul.f32 %v1193_v33, %v3884_v52  ;;  %v1208_v6 = vmul.f32 %v3953_v32, %v3906_v15  ;;  %v1833_v47 = vsel %vm1760_vm14, 1, %v4442_v25  ;;  %v1834_v33 = vsel %vm1761_vm15, 1, %v4442_v25 }
 0x169   : > { %v1220_v0 = vpop.permute.xlu0 %1219  ;;  %v1223_v4 = vpop.permute.xlu1 %1222 }
 0x16a   : > { %vm1245_vm6 = vcmp.eq.s32.totalorder %v1220_v0, 1  ;;  %vm1246_vm7 = vcmp.eq.s32.totalorder %v1223_v4, 1  ;;  %1711 = vperm.xlu0 %2750, %v1685_v44   ;;  %1781 = vperm.xlu1 %2751, %v2596_v59   ;;  %v2591_v59 = vld [vmem:[%s4407_s3 + $0x188] sm:$0xff]  ;;  %v2593_v4 = vld [vmem:[%s4407_s3 + $0x198] sm:$0xff] }
 0x16b   : > { %v1254_v39 = vsel %vm1245_vm6, %v2434_v18, %v1200_v31  ;;  %v1255_v12 = vsel %vm1246_vm7, %v2435_v3, %v1201_v7  ;;  %v2592_v18 = vld [vmem:[%s4407_s3 + $0x190] sm:$0xff]  ;;  %v1835_v3 = vsel %vm1762_vm1, 1, %v4442_v25  ;;  %v1836_v31 = vsel %vm1763_vm2, 1, %v4442_v25 }
 0x16c   : > { %2461 = vst [vmem:[%s3855_s14 + $0x48] sm:$0xff] %v1254_v39  ;;  %2462 = vst [vmem:[%s3855_s14 + $0x50] sm:$0xff] %v1255_v12  ;;  %vm1764_vm3 = vcmp.gt.f32.partialorder %v2591_v59, 0.5  ;;  %vm1765_vm4 = vcmp.gt.f32.partialorder %v2592_v18, 0.5  ;;  %v2594_v39 = vld [vmem:[%s4407_s3 + $0x1a0] sm:$0xff]  ;;  %vm1766_vm5 = vcmp.gt.f32.partialorder %v2593_v4, 0.5 }
 0x16d   : > { %v1226_v41 = vpop.permute.xlu0 %1225  ;;  %v1229_v46 = vpop.permute.xlu1 %1228  ;;  %v1837_v12 = vsel %vm1764_vm3, 1, %v4442_v25  ;;  %vm1767_vm6 = vcmp.gt.f32.partialorder %v2594_v39, 0.5  ;;  %v2623_v18 = vld [vmem:[%s4407_s3 + $0x1b0] sm:$0xff] }
 0x16e   : > { %vm1247_vm8 = vcmp.eq.s32.totalorder %v1226_v41, 1  ;;  %vm1248_vm9 = vcmp.eq.s32.totalorder %v1229_v46, 1  ;;  %1786 = vperm.xlu0 %2750, %v2597_v14   ;;  %1791 = vperm.xlu1 %2751, %v2598_v30   ;;  %v1838_v14 = vsel %vm1765_vm4, 1, %v4442_v25  ;;  %v2640_v4 = vld [vmem:[%s4408_s4 + $0x1f0] sm:$0xff] }
 0x16f   : > { %v1256_v19 = vsel %vm1247_vm8, %v2436_v20, %v1202_v50  ;;  %v1257_v36 = vsel %vm1248_vm9, %v2437_v63, %v1203_v38  ;;  %v2595_v63 = vld [vmem:[%s4407_s3 + $0x1a8] sm:$0xff]  ;;  %v1839_v50 = vsel %vm1766_vm5, 1, %v4442_v25  ;;  %v1840_v38 = vsel %vm1767_vm6, 1, %v4442_v25  ;;  %v2478_v39 = vld [vmem:[%s3488_s9 + $0xd0] sm:$0xff] }
 0x170   : > { %2463 = vst [vmem:[%s3855_s14 + $0x58] sm:$0xff] %v1256_v19  ;;  %2464 = vst [vmem:[%s3855_s14 + $0x60] sm:$0xff] %v1257_v36  ;;  %vm1768_vm7 = vcmp.gt.f32.partialorder %v2595_v63, 0.5  ;;  %v2632_v36 = vld [vmem:[%s4408_s4 + $0x1b0] sm:$0xff]  ;;  %v2626_v63 = vld [vmem:[%s4407_s3 + $0x1c8] sm:$0xff] }
 0x171   : > { %v1232_v26 = vpop.permute.xlu0 %1231  ;;  %v1235_v11 = vpop.permute.xlu1 %1234  ;;  %v1841_v19 = vsel %vm1768_vm7, 1, %v4442_v25  ;;  %vm1919_vm4 = vcmp.gt.f32.partialorder %v2626_v63, 0.5  ;;  %v2674_v63 = vld [vmem:[%s4408_s4 + $0x228] sm:$0xff] }
 0x172   : > { %vm1249_vm10 = vcmp.eq.s32.totalorder %v1232_v26, 1  ;;  %vm1250_vm11 = vcmp.eq.s32.totalorder %v1235_v11, 1  ;;  %1796 = vperm.xlu0 %2750, %v2599_v53   ;;  %1801 = vperm.xlu1 %2751, %v2600_v22   ;;  %v2470_v53 = vld [vmem:[%s3488_s9 + $0x90] sm:$0xff]  ;;  %v2471_v22 = vld [vmem:[%s3488_s9 + $0x98] sm:$0xff] }
 0x173   : > { %v1258_v1 = vsel %vm1249_vm10, %v2438_v28, %v1204_v56  ;;  %v1259_v49 = vsel %vm1250_vm11, %v2439_v2, %v1205_v5 }
 0x174   : > { %2465 = vst [vmem:[%s3855_s14 + $0x68] sm:$0xff] %v1258_v1  ;;  %2466 = vst [vmem:[%s3855_s14 + $0x70] sm:$0xff] %v1259_v49  ;;  %v2633_v1 = vld [vmem:[%s4408_s4 + $0x1b8] sm:$0xff]  ;;  %v2634_v49 = vld [vmem:[%s4408_s4 + $0x1c0] sm:$0xff] }
 0x175   : > { %v1238_v27 = vpop.permute.xlu0 %1237  ;;  %v1241_v34 = vpop.permute.xlu1 %1240 }
 0x176   : > { %vm1251_vm12 = vcmp.eq.s32.totalorder %v1238_v27, 1  ;;  %vm1252_vm13 = vcmp.eq.s32.totalorder %v1241_v34, 1  ;;  %1806 = vperm.xlu0 %2750, %v2601_v58   ;;  %1811 = vperm.xlu1 %2751, %v2602_v62   ;;  %v2472_v58 = vld [vmem:[%s3488_s9 + $0xa0] sm:$0xff]  ;;  %v2473_v62 = vld [vmem:[%s3488_s9 + $0xa8] sm:$0xff] }
 0x177   : > { %v1260_v23 = vsel %vm1251_vm12, %v2440_v54, %v1206_v42  ;;  %v1261_v21 = vsel %vm1252_vm13, %v2441_v9, %v1207_v40 }
 0x178   : > { %2467 = vst [vmem:[%s3855_s14 + $0x78] sm:$0xff] %v1260_v23  ;;  %2468 = vst [vmem:[%s3855_s14 + $0x80] sm:$0xff] %v1261_v21  ;;  %v2474_v23 = vld [vmem:[%s3488_s9 + $0xb0] sm:$0xff]  ;;  %v2475_v21 = vld [vmem:[%s3488_s9 + $0xb8] sm:$0xff] }
 0x179   : > { %v1244_v45 = vpop.permute.xlu0 %1243  ;;  %v1314_v8 = vpop.permute.xlu1 %1313 }
 0x17a   : > { %vm1253_vm0 = vcmp.eq.s32.totalorder %v1244_v45, 1  ;;  %1816 = vperm.xlu0 %2750, %v2603_v24   ;;  %1821 = vperm.xlu1 %2751, %v2604_v61   ;;  %v1356_v28 = vmul.f32 %v1314_v8, %v3821_v35 }
 0x17b   : > { %v1262_v16 = vsel %vm1253_vm0, %v2442_v13, %v1208_v6  ;;  %vm1916_vm0 = vcmp.gt.f32.partialorder %v2623_v18, 0.5  ;;  %v2671_v18 = vld [vmem:[%s4408_s4 + $0x210] sm:$0xff] }
 0x17c   : > { %2469 = vst [vmem:[%s3855_s14 + $0x88] sm:$0xff] %v1262_v16  ;;  %v2476_v16 = vld [vmem:[%s3488_s9 + $0xc0] sm:$0xff] }
 0x17d   : > { %v1319_v32 = vpop.permute.xlu0 %1318  ;;  %v1324_v44 = vpop.permute.xlu1 %1323 }
 0x17e   : > { %1843 = vperm.xlu0 %2750, %v1833_v47   ;;  %1846 = vperm.xlu1 %2751, %v1834_v33   ;;  %v1357_v2 = vmul.f32 %v1319_v32, %v3823_v37  ;;  %v1358_v54 = vmul.f32 %v1324_v44, %v3834_v48  ;;  %v2477_v47 = vld [vmem:[%s3488_s9 + $0xc8] sm:$0xff] }
 0x181   : > { %v1329_v7 = vpop.permute.xlu0 %1328  ;;  %v1334_v0 = vpop.permute.xlu1 %1333 }
 0x182   : > { %1849 = vperm.xlu0 %2750, %v1835_v3   ;;  %1852 = vperm.xlu1 %2751, %v1836_v31   ;;  %v1359_v9 = vmul.f32 %v1329_v7, %v3841_v43  ;;  %v1360_v24 = vmul.f32 %v1334_v0, %v3859_v17  ;;  %v2624_v3 = vld [vmem:[%s4407_s3 + $0x1b8] sm:$0xff]  ;;  %v2639_v0 = vld [vmem:[%s4408_s4 + $0x1e8] sm:$0xff] }
 0x183   : > { %vm1917_vm1 = vcmp.gt.f32.partialorder %v2624_v3, 0.5  ;;  %v2672_v3 = vld [vmem:[%s4408_s4 + $0x218] sm:$0xff] }
 0x185   : > { %v1339_v30 = vpop.permute.xlu0 %1338  ;;  %v4042_v20 = vpop.permute.xlu1 %1343 }
 0x186   : > { %1855 = vperm.xlu0 %2750, %v1837_v12   ;;  %1858 = vperm.xlu1 %2751, %v1838_v14   ;;  %v1361_v61 = vmul.f32 %v1339_v30, %v3865_v51  ;;  %v1362_v33 = vmul.f32 %v4042_v20, %v3882_v29  ;;  %v2625_v20 = vld [vmem:[%s4407_s3 + $0x1c0] sm:$0xff] }
 0x187   : > { %vm1918_vm3 = vcmp.gt.f32.partialorder %v2625_v20, 0.5  ;;  %v2673_v20 = vld [vmem:[%s4408_s4 + $0x220] sm:$0xff] }
 0x189   : > { %v1349_v41 = vpop.permute.xlu0 %1348  ;;  %v4049_v46 = vpop.permute.xlu1 %1353 }
 0x18a   : > { %1861 = vperm.xlu0 %2750, %v1839_v50   ;;  %1864 = vperm.xlu1 %2751, %v1840_v38   ;;  %v1363_v32 = vmul.f32 %v1349_v41, %v3884_v52  ;;  %v1364_v12 = vmul.f32 %v4049_v46, %v3906_v15  ;;  %v1989_v38 = vsel %vm1916_vm0, 1, %v4442_v25  ;;  %v1990_v41 = vsel %vm1917_vm1, 1, %v4442_v25 }
 0x18d   : > { %v1376_v56 = vpop.permute.xlu0 %1375  ;;  %v1379_v5 = vpop.permute.xlu1 %1378 }
 0x18e   : > { %vm1401_vm8 = vcmp.eq.s32.totalorder %v1376_v56, 1  ;;  %vm1402_vm9 = vcmp.eq.s32.totalorder %v1379_v5, 1  ;;  %1867 = vperm.xlu0 %2750, %v1841_v19   ;;  %1937 = vperm.xlu1 %2751, %v2632_v36   ;;  %v2627_v36 = vld [vmem:[%s4407_s3 + $0x1d0] sm:$0xff]  ;;  %v2629_v5 = vld [vmem:[%s4407_s3 + $0x1e0] sm:$0xff] }
 0x18f   : > { %v1410_v26 = vsel %vm1401_vm8, %v2470_v53, %v1356_v28  ;;  %v1411_v11 = vsel %vm1402_vm9, %v2471_v22, %v1357_v2  ;;  %v2628_v53 = vld [vmem:[%s4407_s3 + $0x1d8] sm:$0xff]  ;;  %v1991_v22 = vsel %vm1918_vm3, 1, %v4442_v25  ;;  %v1992_v28 = vsel %vm1919_vm4, 1, %v4442_v25 }
 0x190   : > { %2497 = vst [vmem:[%s3855_s14 + $0x90] sm:$0xff] %v1410_v26  ;;  %2498 = vst [vmem:[%s3855_s14 + $0x98] sm:$0xff] %v1411_v11  ;;  %vm1920_vm5 = vcmp.gt.f32.partialorder %v2627_v36, 0.5  ;;  %vm1921_vm6 = vcmp.gt.f32.partialorder %v2628_v53, 0.5  ;;  %v2630_v26 = vld [vmem:[%s4407_s3 + $0x1e8] sm:$0xff]  ;;  %vm1922_vm7 = vcmp.gt.f32.partialorder %v2629_v5, 0.5 }
 0x191   : > { %v1382_v42 = vpop.permute.xlu0 %1381  ;;  %v1385_v40 = vpop.permute.xlu1 %1384  ;;  %v1993_v11 = vsel %vm1920_vm5, 1, %v4442_v25  ;;  %vm1923_vm8 = vcmp.gt.f32.partialorder %v2630_v26, 0.5  ;;  %v2659_v53 = vld [vmem:[%s4407_s3 + $0x1f8] sm:$0xff] }
 0x192   : > { %vm1403_vm10 = vcmp.eq.s32.totalorder %v1382_v42, 1  ;;  %vm1404_vm11 = vcmp.eq.s32.totalorder %v1385_v40, 1  ;;  %1942 = vperm.xlu0 %2750, %v2633_v1   ;;  %1947 = vperm.xlu1 %2751, %v2634_v49   ;;  %v1994_v1 = vsel %vm1921_vm6, 1, %v4442_v25  ;;  %v2676_v5 = vld [vmem:[%s4408_s4 + $0x238] sm:$0xff] }
 0x193   : > { %v1412_v27 = vsel %vm1403_vm10, %v2472_v58, %v1358_v54  ;;  %v1413_v34 = vsel %vm1404_vm11, %v2473_v62, %v1359_v9  ;;  %v2631_v62 = vld [vmem:[%s4407_s3 + $0x1f0] sm:$0xff]  ;;  %v1995_v54 = vsel %vm1922_vm7, 1, %v4442_v25  ;;  %v1996_v9 = vsel %vm1923_vm8, 1, %v4442_v25  ;;  %v2514_v26 = vld [vmem:[%s3488_s9 + $0x118] sm:$0xff] }
 0x194   : > { %2499 = vst [vmem:[%s3855_s14 + $0xa0] sm:$0xff] %v1412_v27  ;;  %2500 = vst [vmem:[%s3855_s14 + $0xa8] sm:$0xff] %v1413_v34  ;;  %vm1924_vm9 = vcmp.gt.f32.partialorder %v2631_v62, 0.5  ;;  %v2668_v34 = vld [vmem:[%s4408_s4 + $0x1f8] sm:$0xff]  ;;  %v2662_v62 = vld [vmem:[%s4407_s3 + $0x210] sm:$0xff] }
 0x195   : > { %v1388_v13 = vpop.permute.xlu0 %1387  ;;  %v1391_v6 = vpop.permute.xlu1 %1390  ;;  %v1997_v27 = vsel %vm1924_vm9, 1, %v4442_v25  ;;  %vm2075_vm6 = vcmp.gt.f32.partialorder %v2662_v62, 0.5 }
 0x196   : > { %vm1405_vm12 = vcmp.eq.s32.totalorder %v1388_v13, 1  ;;  %vm1406_vm13 = vcmp.eq.s32.totalorder %v1391_v6, 1  ;;  %1952 = vperm.xlu0 %2750, %v2635_v55   ;;  %1957 = vperm.xlu1 %2751, %v2636_v60   ;;  %v2506_v55 = vld [vmem:[%s3488_s9 + $0xd8] sm:$0xff]  ;;  %v2507_v60 = vld [vmem:[%s3488_s9 + $0xe0] sm:$0xff] }
 0x197   : > { %v1414_v45 = vsel %vm1405_vm12, %v2474_v23, %v1360_v24  ;;  %v1415_v8 = vsel %vm1406_vm13, %v2475_v21, %v1361_v61 }
 0x198   : > { %2501 = vst [vmem:[%s3855_s14 + $0xb0] sm:$0xff] %v1414_v45  ;;  %2502 = vst [vmem:[%s3855_s14 + $0xb8] sm:$0xff] %v1415_v8  ;;  %v2669_v45 = vld [vmem:[%s4408_s4 + $0x200] sm:$0xff]  ;;  %v2670_v8 = vld [vmem:[%s4408_s4 + $0x208] sm:$0xff] }
 0x199   : > { %v1394_v44 = vpop.permute.xlu0 %1393  ;;  %v1397_v59 = vpop.permute.xlu1 %1396 }
 0x19a   : > { %vm1407_vm14 = vcmp.eq.s32.totalorder %v1394_v44, 1  ;;  %vm1408_vm15 = vcmp.eq.s32.totalorder %v1397_v59, 1  ;;  %1962 = vperm.xlu0 %2750, %v2637_v10   ;;  %1967 = vperm.xlu1 %2751, %v2638_v57   ;;  %v2508_v10 = vld [vmem:[%s3488_s9 + $0xe8] sm:$0xff]  ;;  %v2509_v57 = vld [vmem:[%s3488_s9 + $0xf0] sm:$0xff] }
 0x19b   : > { %v1416_v31 = vsel %vm1407_vm14, %v2476_v16, %v1362_v33  ;;  %v1417_v7 = vsel %vm1408_vm15, %v2477_v47, %v1363_v32 }
 0x19c   : > { %2503 = vst [vmem:[%s3855_s14 + $0xc0] sm:$0xff] %v1416_v31  ;;  %2504 = vst [vmem:[%s3855_s14 + $0xc8] sm:$0xff] %v1417_v7  ;;  %v2510_v31 = vld [vmem:[%s3488_s9 + $0xf8] sm:$0xff]  ;;  %v2511_v7 = vld [vmem:[%s3488_s9 + $0x100] sm:$0xff] }
 0x19d   : > { %v1400_v14 = vpop.permute.xlu0 %1399  ;;  %v1470_v30 = vpop.permute.xlu1 %1469 }
 0x19e   : > { %vm1409_vm2 = vcmp.eq.s32.totalorder %v1400_v14, 1  ;;  %1972 = vperm.xlu0 %2750, %v2639_v0   ;;  %1977 = vperm.xlu1 %2751, %v2640_v4   ;;  %v1512_v23 = vmul.f32 %v1470_v30, %v3821_v35 }
 0x19f   : > { %v1418_v50 = vsel %vm1409_vm2, %v2478_v39, %v1364_v12  ;;  %vm2072_vm2 = vcmp.gt.f32.partialorder %v2659_v53, 0.5 }
 0x1a0   : > { %2505 = vst [vmem:[%s3855_s14 + $0xd0] sm:$0xff] %v1418_v50  ;;  %v2512_v50 = vld [vmem:[%s3488_s9 + $0x108] sm:$0xff] }
 0x1a1   : > { %v1475_v46 = vpop.permute.xlu0 %1474  ;;  %v1480_v19 = vpop.permute.xlu1 %1479 }
 0x1a2   : > { %1999 = vperm.xlu0 %2750, %v1989_v38   ;;  %2002 = vperm.xlu1 %2751, %v1990_v41   ;;  %v1513_v21 = vmul.f32 %v1475_v46, %v3823_v37  ;;  %v1514_v16 = vmul.f32 %v1480_v19, %v3834_v48  ;;  %v2513_v38 = vld [vmem:[%s3488_s9 + $0x110] sm:$0xff] }
 0x1a5   : > { %v1485_v2 = vpop.permute.xlu0 %1484  ;;  %v1490_v56 = vpop.permute.xlu1 %1489 }
 0x1a6   : > { %2005 = vperm.xlu0 %2750, %v1991_v22   ;;  %2008 = vperm.xlu1 %2751, %v1992_v28   ;;  %v1515_v47 = vmul.f32 %v1485_v2, %v3841_v43  ;;  %v1516_v0 = vmul.f32 %v1490_v56, %v3859_v17  ;;  %v2660_v22 = vld [vmem:[%s4407_s3 + $0x200] sm:$0xff]  ;;  %v2675_v56 = vld [vmem:[%s4408_s4 + $0x230] sm:$0xff] }
 0x1a7   : > { %vm2073_vm3 = vcmp.gt.f32.partialorder %v2660_v22, 0.5 }
 0x1a9   : > { %v1495_v49 = vpop.permute.xlu0 %1494  ;;  %v4138_v58 = vpop.permute.xlu1 %1499 }
 0x1aa   : > { %2011 = vperm.xlu0 %2750, %v1993_v11   ;;  %2014 = vperm.xlu1 %2751, %v1994_v1   ;;  %v1517_v4 = vmul.f32 %v1495_v49, %v3865_v51  ;;  %v1518_v41 = vmul.f32 %v4138_v58, %v3882_v29  ;;  %v2661_v58 = vld [vmem:[%s4407_s3 + $0x208] sm:$0xff] }
 0x1ab   : > { %vm2074_vm5 = vcmp.gt.f32.partialorder %v2661_v58, 0.5 }
 0x1ad   : > { %v1505_v42 = vpop.permute.xlu0 %1504  ;;  %v4145_v40 = vpop.permute.xlu1 %1509 }
 0x1ae   : > { %2017 = vperm.xlu0 %2750, %v1995_v54   ;;  %2020 = vperm.xlu1 %2751, %v1996_v9   ;;  %v1519_v46 = vmul.f32 %v1505_v42, %v3884_v52  ;;  %v1520_v11 = vmul.f32 %v4145_v40, %v3906_v15  ;;  %v2145_v9 = vsel %vm2072_vm2, 1, %v4442_v25  ;;  %v2146_v42 = vsel %vm2073_vm3, 1, %v4442_v25 }
 0x1b1   : > { %v1532_v24 = vpop.permute.xlu0 %1531  ;;  %v1535_v61 = vpop.permute.xlu1 %1534 }
 0x1b2   : > { %vm1557_vm10 = vcmp.eq.s32.totalorder %v1532_v24, 1  ;;  %vm1558_vm11 = vcmp.eq.s32.totalorder %v1535_v61, 1  ;;  %2023 = vperm.xlu0 %2750, %v1997_v27   ;;  %2093 = vperm.xlu1 %2751, %v2668_v34   ;;  %v2663_v34 = vld [vmem:[%s4407_s3 + $0x218] sm:$0xff]  ;;  %v2665_v61 = vld [vmem:[%s4407_s3 + $0x228] sm:$0xff] }
 0x1b3   : > { %v1566_v13 = vsel %vm1557_vm10, %v2506_v55, %v1512_v23  ;;  %v1567_v6 = vsel %vm1558_vm11, %v2507_v60, %v1513_v21  ;;  %v2664_v55 = vld [vmem:[%s4407_s3 + $0x220] sm:$0xff]  ;;  %v2147_v60 = vsel %vm2074_vm5, 1, %v4442_v25  ;;  %v2148_v23 = vsel %vm2075_vm6, 1, %v4442_v25 }
 0x1b4   : > { %2533 = vst [vmem:[%s3855_s14 + $0xd8] sm:$0xff] %v1566_v13  ;;  %2534 = vst [vmem:[%s3855_s14 + $0xe0] sm:$0xff] %v1567_v6  ;;  %vm2076_vm7 = vcmp.gt.f32.partialorder %v2663_v34, 0.5  ;;  %vm2077_vm8 = vcmp.gt.f32.partialorder %v2664_v55, 0.5  ;;  %v2666_v13 = vld [vmem:[%s4407_s3 + $0x230] sm:$0xff]  ;;  %vm2078_vm9 = vcmp.gt.f32.partialorder %v2665_v61, 0.5 }
 0x1b5   : > { %v1538_v33 = vpop.permute.xlu0 %1537  ;;  %v1541_v32 = vpop.permute.xlu1 %1540  ;;  %v2149_v6 = vsel %vm2076_vm7, 1, %v4442_v25  ;;  %vm2079_vm10 = vcmp.gt.f32.partialorder %v2666_v13, 0.5 }
 0x1b6   : > { %vm1559_vm12 = vcmp.eq.s32.totalorder %v1538_v33, 1  ;;  %vm1560_vm13 = vcmp.eq.s32.totalorder %v1541_v32, 1  ;;  %2098 = vperm.xlu0 %2750, %v2669_v45   ;;  %2103 = vperm.xlu1 %2751, %v2670_v8   ;;  %v2150_v45 = vsel %vm2077_vm8, 1, %v4442_v25 }
 0x1b7   : > { %v1568_v44 = vsel %vm1559_vm12, %v2508_v10, %v1514_v16  ;;  %v1569_v59 = vsel %vm1560_vm13, %v2509_v57, %v1515_v47  ;;  %v2667_v57 = vld [vmem:[%s4407_s3 + $0x238] sm:$0xff]  ;;  %v2151_v16 = vsel %vm2078_vm9, 1, %v4442_v25  ;;  %v2152_v47 = vsel %vm2079_vm10, 1, %v4442_v25 }
 0x1b8   : > { %2535 = vst [vmem:[%s3855_s14 + $0xe8] sm:$0xff] %v1568_v44  ;;  %2536 = vst [vmem:[%s3855_s14 + $0xf0] sm:$0xff] %v1569_v59  ;;  %vm2080_vm11 = vcmp.gt.f32.partialorder %v2667_v57, 0.5  ;;  %v2542_v59 = vld [vmem:[%s3488_s9 + $0x120] sm:$0xff] }
 0x1b9   : > { %v1544_v39 = vpop.permute.xlu0 %1543  ;;  %v1547_v12 = vpop.permute.xlu1 %1546  ;;  %v2153_v44 = vsel %vm2080_vm11, 1, %v4442_v25  ;;  %v2544_v25 = vld [vmem:[%s3488_s9 + $0x130] sm:$0xff] }
 0x1ba   : > { %vm1561_vm14 = vcmp.eq.s32.totalorder %v1544_v39, 1  ;;  %vm1562_vm15 = vcmp.eq.s32.totalorder %v1547_v12, 1  ;;  %2108 = vperm.xlu0 %2750, %v2671_v18   ;;  %2113 = vperm.xlu1 %2751, %v2672_v3   ;;  %v2543_v18 = vld [vmem:[%s3488_s9 + $0x128] sm:$0xff]  ;;  %v2545_v12 = vld [vmem:[%s3488_s9 + $0x138] sm:$0xff] }
 0x1bb   : > { %v1570_v14 = vsel %vm1561_vm14, %v2510_v31, %v1516_v0  ;;  %v1571_v30 = vsel %vm1562_vm15, %v2511_v7, %v1517_v4 }
 0x1bc   : > { %2537 = vst [vmem:[%s3855_s14 + $0xf8] sm:$0xff] %v1570_v14  ;;  %2538 = vst [vmem:[%s3855_s14 + $0x100] sm:$0xff] %v1571_v30 }
 0x1bd   : > { %v1550_v19 = vpop.permute.xlu0 %1549  ;;  %v1553_v36 = vpop.permute.xlu1 %1552 }
 0x1be   : > { %vm1563_vm0 = vcmp.eq.s32.totalorder %v1550_v19, 1  ;;  %vm1564_vm1 = vcmp.eq.s32.totalorder %v1553_v36, 1  ;;  %2118 = vperm.xlu0 %2750, %v2673_v20   ;;  %2123 = vperm.xlu1 %2751, %v2674_v63  }
 0x1bf   : > { %v1572_v28 = vsel %vm1563_vm0, %v2512_v50, %v1518_v41  ;;  %v1573_v2 = vsel %vm1564_vm1, %v2513_v38, %v1519_v46  ;;  %v2546_v41 = vld [vmem:[%s3488_s9 + $0x140] sm:$0xff]  ;;  %v2547_v46 = vld [vmem:[%s3488_s9 + $0x148] sm:$0xff] }
 0x1c0   : > { %2539 = vst [vmem:[%s3855_s14 + $0x108] sm:$0xff] %v1572_v28  ;;  %2540 = vst [vmem:[%s3855_s14 + $0x110] sm:$0xff] %v1573_v2 }
 0x1c1   : > { %v1556_v1 = vpop.permute.xlu0 %1555  ;;  %v1626_v49 = vpop.permute.xlu1 %1625 }
 0x1c2   : > { %vm1565_vm4 = vcmp.eq.s32.totalorder %v1556_v1, 1  ;;  %2128 = vperm.xlu0 %2750, %v2675_v56   ;;  %2133 = vperm.xlu1 %2751, %v2676_v5   ;;  %v1668_v3 = vmul.f32 %v1626_v49, %v3821_v35  ;;  %v2548_v56 = vld [vmem:[%s3488_s9 + $0x150] sm:$0xff]  ;;  %v2549_v5 = vld [vmem:[%s3488_s9 + $0x158] sm:$0xff] }
 0x1c3   : > { %v1574_v54 = vsel %vm1565_vm4, %v2514_v26, %v1520_v11 }
 0x1c4   : > { %2541 = vst [vmem:[%s3855_s14 + $0x118] sm:$0xff] %v1574_v54  ;;  %v2550_v54 = vld [vmem:[%s3488_s9 + $0x160] sm:$0xff] }
 0x1c5   : > { %v1631_v40 = vpop.permute.xlu0 %1630  ;;  %v1636_v27 = vpop.permute.xlu1 %1635 }
 0x1c6   : > { %2155 = vperm.xlu0 %2750, %v2145_v9   ;;  %2158 = vperm.xlu1 %2751, %v2146_v42   ;;  %v1669_v31 = vmul.f32 %v1631_v40, %v3823_v37  ;;  %v1670_v14 = vmul.f32 %v1636_v27, %v3834_v48 }
 0x1c9   : > { %v1641_v21 = vpop.permute.xlu0 %1640  ;;  %v1646_v24 = vpop.permute.xlu1 %1645 }
 0x1ca   : > { %2161 = vperm.xlu0 %2750, %v2147_v60   ;;  %2164 = vperm.xlu1 %2751, %v2148_v23   ;;  %v1671_v30 = vmul.f32 %v1641_v21, %v3841_v43  ;;  %v1672_v19 = vmul.f32 %v1646_v24, %v3859_v17 }
 0x1cd   : > { %v1651_v8 = vpop.permute.xlu0 %1650  ;;  %v1656_v10 = vpop.permute.xlu1 %1655 }
 0x1ce   : > { %2167 = vperm.xlu0 %2750, %v2149_v6   ;;  %2170 = vperm.xlu1 %2751, %v2150_v45   ;;  %v1673_v36 = vmul.f32 %v1651_v8, %v3865_v51  ;;  %v1674_v26 = vmul.f32 %v1656_v10, %v3882_v29  ;;  %v2578_v6 = vld [vmem:[%s3488_s9 + $0x168] sm:$0xff]  ;;  %v2579_v45 = vld [vmem:[%s3488_s9 + $0x170] sm:$0xff] }
 0x1d1   : > { %v1661_v33 = vpop.permute.xlu0 %1660  ;;  %v1666_v32 = vpop.permute.xlu1 %1665 }
 0x1d2   : > { %2173 = vperm.xlu0 %2750, %v2151_v16   ;;  %2176 = vperm.xlu1 %2751, %v2152_v47   ;;  %v1675_v11 = vmul.f32 %v1661_v33, %v3884_v52  ;;  %v1676_v9 = vmul.f32 %v1666_v32, %v3906_v15  ;;  %v2580_v32 = vld [vmem:[%s3488_s9 + $0x178] sm:$0xff] }
 0x1d5   : > { %v1688_v7 = vpop.permute.xlu0 %1687  ;;  %v1691_v0 = vpop.permute.xlu1 %1690 }
 0x1d6   : > { %vm1713_vm12 = vcmp.eq.s32.totalorder %v1688_v7, 1  ;;  %vm1714_vm13 = vcmp.eq.s32.totalorder %v1691_v0, 1  ;;  %2179 = vperm.xlu0 %2750, %v2153_v44   ;;  %v2581_v44 = vld [vmem:[%s3488_s9 + $0x180] sm:$0xff] }
 0x1d7   : > { %v1722_v4 = vsel %vm1713_vm12, %v2542_v59, %v1668_v3  ;;  %v1723_v39 = vsel %vm1714_vm13, %v2543_v18, %v1669_v31 }
 0x1d8   : > { %2569 = vst [vmem:[%s3855_s14 + $0x120] sm:$0xff] %v1722_v4  ;;  %2570 = vst [vmem:[%s3855_s14 + $0x128] sm:$0xff] %v1723_v39  ;;  %v2582_v4 = vld [vmem:[%s3488_s9 + $0x188] sm:$0xff]  ;;  %v2583_v39 = vld [vmem:[%s3488_s9 + $0x190] sm:$0xff] }
 0x1d9   : > { %v1694_v20 = vpop.permute.xlu0 %1693  ;;  %v1697_v63 = vpop.permute.xlu1 %1696 }
 0x1da   : > { %vm1715_vm14 = vcmp.eq.s32.totalorder %v1694_v20, 1  ;;  %vm1716_vm15 = vcmp.eq.s32.totalorder %v1697_v63, 1 }
 0x1db   : > { %v1724_v50 = vsel %vm1715_vm14, %v2544_v25, %v1670_v14  ;;  %v1725_v38 = vsel %vm1716_vm15, %v2545_v12, %v1671_v30 }
 0x1dc   : > { %2571 = vst [vmem:[%s3855_s14 + $0x130] sm:$0xff] %v1724_v50  ;;  %2572 = vst [vmem:[%s3855_s14 + $0x138] sm:$0xff] %v1725_v38  ;;  %v2584_v50 = vld [vmem:[%s3488_s9 + $0x198] sm:$0xff]  ;;  %v2585_v38 = vld [vmem:[%s3488_s9 + $0x1a0] sm:$0xff] }
 0x1dd   : > { %v1700_v53 = vpop.permute.xlu0 %1699  ;;  %v1703_v22 = vpop.permute.xlu1 %1702 }
 0x1de   : > { %vm1717_vm0 = vcmp.eq.s32.totalorder %v1700_v53, 1  ;;  %vm1718_vm1 = vcmp.eq.s32.totalorder %v1703_v22, 1 }
 0x1df   : > { %v1726_v28 = vsel %vm1717_vm0, %v2546_v41, %v1672_v19  ;;  %v1727_v2 = vsel %vm1718_vm1, %v2547_v46, %v1673_v36 }
 0x1e0   : > { %2573 = vst [vmem:[%s3855_s14 + $0x140] sm:$0xff] %v1726_v28  ;;  %2574 = vst [vmem:[%s3855_s14 + $0x148] sm:$0xff] %v1727_v2  ;;  %v2586_v28 = vld [vmem:[%s3488_s9 + $0x1a8] sm:$0xff] }
 0x1e1   : > { %v1706_v1 = vpop.permute.xlu0 %1705  ;;  %v1709_v49 = vpop.permute.xlu1 %1708 }
 0x1e2   : > { %vm1719_vm2 = vcmp.eq.s32.totalorder %v1706_v1, 1  ;;  %vm1720_vm3 = vcmp.eq.s32.totalorder %v1709_v49, 1 }
 0x1e3   : > { %v1728_v58 = vsel %vm1719_vm2, %v2548_v56, %v1674_v26  ;;  %v1729_v62 = vsel %vm1720_vm3, %v2549_v5, %v1675_v11 }
 0x1e4   : > { %2575 = vst [vmem:[%s3855_s14 + $0x150] sm:$0xff] %v1728_v58  ;;  %2576 = vst [vmem:[%s3855_s14 + $0x158] sm:$0xff] %v1729_v62 }
 0x1e5   : > { %v1712_v42 = vpop.permute.xlu0 %1711  ;;  %v1782_v40 = vpop.permute.xlu1 %1781 }
 0x1e6   : > { %vm1721_vm4 = vcmp.eq.s32.totalorder %v1712_v42, 1  ;;  %v1824_v8 = vmul.f32 %v1782_v40, %v3821_v35  ;;  %v2614_v40 = vld [vmem:[%s3488_s9 + $0x1b0] sm:$0xff] }
 0x1e7   : > { %v1730_v27 = vsel %vm1721_vm4, %v2550_v54, %v1676_v9 }
 0x1e8   : > { %2577 = vst [vmem:[%s3855_s14 + $0x160] sm:$0xff] %v1730_v27  ;;  %v2615_v27 = vld [vmem:[%s3488_s9 + $0x1b8] sm:$0xff] }
 0x1e9   : > { %v1787_v34 = vpop.permute.xlu0 %1786  ;;  %v1792_v55 = vpop.permute.xlu1 %1791 }
 0x1ea   : > { %v1825_v10 = vmul.f32 %v1787_v34, %v3823_v37  ;;  %v1826_v59 = vmul.f32 %v1792_v55, %v3834_v48 }
 0x1ed   : > { %v1797_v60 = vpop.permute.xlu0 %1796  ;;  %v1802_v23 = vpop.permute.xlu1 %1801 }
 0x1ee   : > { %v1827_v18 = vmul.f32 %v1797_v60, %v3841_v43  ;;  %v1828_v25 = vmul.f32 %v1802_v23, %v3859_v17 }
 0x1f1   : > { %v1807_v21 = vpop.permute.xlu0 %1806  ;;  %v1812_v24 = vpop.permute.xlu1 %1811 }
 0x1f2   : > { %v1829_v12 = vmul.f32 %v1807_v21, %v3865_v51  ;;  %v1830_v41 = vmul.f32 %v1812_v24, %v3882_v29 }
 0x1f5   : > { %v1817_v61 = vpop.permute.xlu0 %1816  ;;  %v1822_v13 = vpop.permute.xlu1 %1821 }
 0x1f6   : > { %v1831_v46 = vmul.f32 %v1817_v61, %v3884_v52  ;;  %v1832_v2 = vmul.f32 %v1822_v13, %v3906_v15  ;;  %v2616_v61 = vld [vmem:[%s3488_s9 + $0x1c0] sm:$0xff]  ;;  %v2617_v13 = vld [vmem:[%s3488_s9 + $0x1c8] sm:$0xff] }
 0x1f9   : > { %v1844_v57 = vpop.permute.xlu0 %1843  ;;  %v1847_v16 = vpop.permute.xlu1 %1846 }
 0x1fa   : > { %vm1869_vm5 = vcmp.eq.s32.totalorder %v1844_v57, 1  ;;  %vm1870_vm6 = vcmp.eq.s32.totalorder %v1847_v16, 1 }
 0x1fb   : > { %v1878_v47 = vsel %vm1869_vm5, %v2578_v6, %v1824_v8  ;;  %v1879_v33 = vsel %vm1870_vm6, %v2579_v45, %v1825_v10 }
 0x1fc   : > { %2605 = vst [vmem:[%s3855_s14 + $0x168] sm:$0xff] %v1878_v47  ;;  %2606 = vst [vmem:[%s3855_s14 + $0x170] sm:$0xff] %v1879_v33  ;;  %v2618_v47 = vld [vmem:[%s3488_s9 + $0x1d0] sm:$0xff]  ;;  %v2619_v33 = vld [vmem:[%s3488_s9 + $0x1d8] sm:$0xff] }
 0x1fd   : > { %v1850_v3 = vpop.permute.xlu0 %1849  ;;  %v1853_v31 = vpop.permute.xlu1 %1852 }
 0x1fe   : > { %vm1871_vm7 = vcmp.eq.s32.totalorder %v1850_v3, 1  ;;  %vm1872_vm8 = vcmp.eq.s32.totalorder %v1853_v31, 1 }
 0x1ff   : > { %v1880_v7 = vsel %vm1871_vm7, %v2580_v32, %v1826_v59  ;;  %v1881_v0 = vsel %vm1872_vm8, %v2581_v44, %v1827_v18 }
 0x200   : > { %2607 = vst [vmem:[%s3855_s14 + $0x178] sm:$0xff] %v1880_v7  ;;  %2608 = vst [vmem:[%s3855_s14 + $0x180] sm:$0xff] %v1881_v0  ;;  %v2620_v7 = vld [vmem:[%s3488_s9 + $0x1e0] sm:$0xff]  ;;  %v2621_v0 = vld [vmem:[%s3488_s9 + $0x1e8] sm:$0xff] }
 0x201   : > { %v1856_v14 = vpop.permute.xlu0 %1855  ;;  %v1859_v30 = vpop.permute.xlu1 %1858 }
 0x202   : > { %vm1873_vm9 = vcmp.eq.s32.totalorder %v1856_v14, 1  ;;  %vm1874_vm10 = vcmp.eq.s32.totalorder %v1859_v30, 1 }
 0x203   : > { %v1882_v20 = vsel %vm1873_vm9, %v2582_v4, %v1828_v25  ;;  %v1883_v63 = vsel %vm1874_vm10, %v2583_v39, %v1829_v12 }
 0x204   : > { %2609 = vst [vmem:[%s3855_s14 + $0x188] sm:$0xff] %v1882_v20  ;;  %2610 = vst [vmem:[%s3855_s14 + $0x190] sm:$0xff] %v1883_v63  ;;  %v2622_v20 = vld [vmem:[%s3488_s9 + $0x1f0] sm:$0xff] }
 0x205   : > { %v1862_v19 = vpop.permute.xlu0 %1861  ;;  %v1865_v36 = vpop.permute.xlu1 %1864 }
 0x206   : > { %vm1875_vm11 = vcmp.eq.s32.totalorder %v1862_v19, 1  ;;  %vm1876_vm12 = vcmp.eq.s32.totalorder %v1865_v36, 1 }
 0x207   : > { %v1884_v53 = vsel %vm1875_vm11, %v2584_v50, %v1830_v41  ;;  %v1885_v22 = vsel %vm1876_vm12, %v2585_v38, %v1831_v46 }
 0x208   : > { %2611 = vst [vmem:[%s3855_s14 + $0x198] sm:$0xff] %v1884_v53  ;;  %2612 = vst [vmem:[%s3855_s14 + $0x1a0] sm:$0xff] %v1885_v22 }
 0x209   : > { %v1868_v56 = vpop.permute.xlu0 %1867  ;;  %v1938_v5 = vpop.permute.xlu1 %1937 }
 0x20a   : > { %vm1877_vm13 = vcmp.eq.s32.totalorder %v1868_v56, 1  ;;  %v1980_v34 = vmul.f32 %v1938_v5, %v3821_v35  ;;  %v2650_v5 = vld [vmem:[%s3488_s9 + $0x1f8] sm:$0xff] }
 0x20b   : > { %v1886_v26 = vsel %vm1877_vm13, %v2586_v28, %v1832_v2 }
 0x20c   : > { %2613 = vst [vmem:[%s3855_s14 + $0x1a8] sm:$0xff] %v1886_v26  ;;  %v2651_v26 = vld [vmem:[%s3488_s9 + $0x200] sm:$0xff] }
 0x20d   : > { %v1943_v11 = vpop.permute.xlu0 %1942  ;;  %v1948_v1 = vpop.permute.xlu1 %1947 }
 0x20e   : > { %v1981_v55 = vmul.f32 %v1943_v11, %v3823_v37  ;;  %v1982_v6 = vmul.f32 %v1948_v1, %v3834_v48 }
 0x211   : > { %v1953_v49 = vpop.permute.xlu0 %1952  ;;  %v1958_v58 = vpop.permute.xlu1 %1957 }
 0x212   : > { %v1983_v45 = vmul.f32 %v1953_v49, %v3841_v43  ;;  %v1984_v32 = vmul.f32 %v1958_v58, %v3859_v17 }
 0x215   : > { %v1963_v62 = vpop.permute.xlu0 %1962  ;;  %v1968_v54 = vpop.permute.xlu1 %1967 }
 0x216   : > { %v1985_v44 = vmul.f32 %v1963_v62, %v3865_v51  ;;  %v1986_v4 = vmul.f32 %v1968_v54, %v3882_v29 }
 0x219   : > { %v1973_v9 = vpop.permute.xlu0 %1972  ;;  %v1978_v42 = vpop.permute.xlu1 %1977 }
 0x21a   : > { %v1987_v39 = vmul.f32 %v1973_v9, %v3884_v52  ;;  %v1988_v63 = vmul.f32 %v1978_v42, %v3906_v15  ;;  %v2652_v9 = vld [vmem:[%s3488_s9 + $0x208] sm:$0xff]  ;;  %v2653_v42 = vld [vmem:[%s3488_s9 + $0x210] sm:$0xff] }
 0x21d   : > { %v2000_v60 = vpop.permute.xlu0 %1999  ;;  %v2003_v23 = vpop.permute.xlu1 %2002 }
 0x21e   : > { %vm2025_vm14 = vcmp.eq.s32.totalorder %v2000_v60, 1  ;;  %vm2026_vm15 = vcmp.eq.s32.totalorder %v2003_v23, 1  ;;  %v2654_v60 = vld [vmem:[%s3488_s9 + $0x218] sm:$0xff]  ;;  %v2655_v23 = vld [vmem:[%s3488_s9 + $0x220] sm:$0xff] }
 0x21f   : > { %v2034_v21 = vsel %vm2025_vm14, %v2614_v40, %v1980_v34  ;;  %v2035_v24 = vsel %vm2026_vm15, %v2615_v27, %v1981_v55 }
 0x220   : > { %2641 = vst [vmem:[%s3855_s14 + $0x1b0] sm:$0xff] %v2034_v21  ;;  %2642 = vst [vmem:[%s3855_s14 + $0x1b8] sm:$0xff] %v2035_v24 }
 0x221   : > { %v2006_v8 = vpop.permute.xlu0 %2005  ;;  %v2009_v10 = vpop.permute.xlu1 %2008 }
 0x222   : > { %vm2027_vm0 = vcmp.eq.s32.totalorder %v2006_v8, 1  ;;  %vm2028_vm1 = vcmp.eq.s32.totalorder %v2009_v10, 1 }
 0x223   : > { %v2036_v57 = vsel %vm2027_vm0, %v2616_v61, %v1982_v6  ;;  %v2037_v16 = vsel %vm2028_vm1, %v2617_v13, %v1983_v45  ;;  %v2656_v6 = vld [vmem:[%s3488_s9 + $0x228] sm:$0xff]  ;;  %v2657_v45 = vld [vmem:[%s3488_s9 + $0x230] sm:$0xff] }
 0x224   : > { %2643 = vst [vmem:[%s3855_s14 + $0x1c0] sm:$0xff] %v2036_v57  ;;  %2644 = vst [vmem:[%s3855_s14 + $0x1c8] sm:$0xff] %v2037_v16 }
 0x225   : > { %v2012_v59 = vpop.permute.xlu0 %2011  ;;  %v2015_v18 = vpop.permute.xlu1 %2014 }
 0x226   : > { %vm2029_vm2 = vcmp.eq.s32.totalorder %v2012_v59, 1  ;;  %vm2030_vm3 = vcmp.eq.s32.totalorder %v2015_v18, 1 }
 0x227   : > { %v2038_v3 = vsel %vm2029_vm2, %v2618_v47, %v1984_v32  ;;  %v2039_v31 = vsel %vm2030_vm3, %v2619_v33, %v1985_v44  ;;  %v2658_v47 = vld [vmem:[%s3488_s9 + $0x238] sm:$0xff]  ;;  %s2752_s9 = scalar_lea.vmem %s4354_s8, 9216 }
 0x228   : > { %2645 = vst [vmem:[%s3855_s14 + $0x1d0] sm:$0xff] %v2038_v3  ;;  %2646 = vst [vmem:[%s3855_s14 + $0x1d8] sm:$0xff] %v2039_v31  ;;  %p2753_p12 = scmp.ne.s32.totalorder %s4354_s8, %s2752_s9  ;;  %p2760_p2 = scmp.lt.s32.totalorder %s2758_s16, %s2752_s9 }
 0x229   : > { %v2018_v25 = vpop.permute.xlu0 %2017  ;;  %v2021_v12 = vpop.permute.xlu1 %2020 }
 0x22a   : > { %vm2031_vm4 = vcmp.eq.s32.totalorder %v2018_v25, 1  ;;  %vm2032_vm5 = vcmp.eq.s32.totalorder %v2021_v12, 1  ;;  %p2754_p13 = pnand %p2753_p12, %p2904_p4  ;;  %p2761_p3 = por %p2760_p2, %p2759_p1 }
 0x22b   : > { %v2040_v14 = vsel %vm2031_vm4, %v2620_v7, %v1986_v4  ;;  %v2041_v30 = vsel %vm2032_vm5, %v2621_v0, %v1987_v39 }
 0x22c   : > { %2647 = vst [vmem:[%s3855_s14 + $0x1e0] sm:$0xff] %v2040_v14  ;;  %2648 = vst [vmem:[%s3855_s14 + $0x1e8] sm:$0xff] %v2041_v30  ;;  %p2755_p0 = pneg %p2754_p13 }
 0x22d   : > { %v2024_v50 = vpop.permute.xlu0 %2023  ;;  %v2094_v38 = vpop.permute.xlu1 %2093 }
 0x22e   : > { %vm2033_vm6 = vcmp.eq.s32.totalorder %v2024_v50, 1  ;;  %v2136_v11 = vmul.f32 %v2094_v38, %v3821_v35  ;;  %p2762_p5 = pnand %p2761_p3, %p2755_p0 }
 0x22f   : > { %v2042_v41 = vsel %vm2033_vm6, %v2622_v20, %v1988_v63 }
 0x230   : > { %2649 = vst [vmem:[%s3855_s14 + $0x1f0] sm:$0xff] %v2042_v41 }
 0x231   : > { %v2099_v46 = vpop.permute.xlu0 %2098  ;;  %v2104_v19 = vpop.permute.xlu1 %2103 }
 0x232   : > { %v2137_v1 = vmul.f32 %v2099_v46, %v3823_v37  ;;  %v2138_v40 = vmul.f32 %v2104_v19, %v3834_v48 }
 0x235   : > { %v2109_v36 = vpop.permute.xlu0 %2108  ;;  %v2114_v53 = vpop.permute.xlu1 %2113 }
 0x236   : > { %v2139_v35 = vmul.f32 %v2109_v36, %v3841_v43  ;;  %v2140_v21 = vmul.f32 %v2114_v53, %v3859_v17 }
 0x239   : > { %v2119_v22 = vpop.permute.xlu0 %2118  ;;  %v2124_v28 = vpop.permute.xlu1 %2123 }
 0x23a   : > { %v2141_v48 = vmul.f32 %v2119_v22, %v3865_v51  ;;  %v2142_v8 = vmul.f32 %v2124_v28, %v3882_v29 }
 0x23d   : > { %v2129_v2 = vpop.permute.xlu0 %2128  ;;  %v2134_v56 = vpop.permute.xlu1 %2133 }
 0x23e   : > { %v2143_v17 = vmul.f32 %v2129_v2, %v3884_v52  ;;  %v2144_v33 = vmul.f32 %v2134_v56, %v3906_v15 }
 0x241   : > { %v2156_v49 = vpop.permute.xlu0 %2155  ;;  %v2159_v58 = vpop.permute.xlu1 %2158 }
 0x242   : > { %vm2181_vm7 = vcmp.eq.s32.totalorder %v2156_v49, 1  ;;  %vm2182_vm8 = vcmp.eq.s32.totalorder %v2159_v58, 1 }
 0x243   : > { %v2190_v62 = vsel %vm2181_vm7, %v2650_v5, %v2136_v11  ;;  %v2191_v54 = vsel %vm2182_vm8, %v2651_v26, %v2137_v1 }
 0x244   : > { %2677 = vst [vmem:[%s3855_s14 + $0x1f8] sm:$0xff] %v2190_v62  ;;  %2678 = vst [vmem:[%s3855_s14 + $0x200] sm:$0xff] %v2191_v54 }
 0x245   : > { %v2162_v27 = vpop.permute.xlu0 %2161  ;;  %v2165_v37 = vpop.permute.xlu1 %2164 }
 0x246   : > { %vm2183_vm9 = vcmp.eq.s32.totalorder %v2162_v27, 1  ;;  %vm2184_vm10 = vcmp.eq.s32.totalorder %v2165_v37, 1 }
 0x247   : > { %v2192_v34 = vsel %vm2183_vm9, %v2652_v9, %v2138_v40  ;;  %v2193_v55 = vsel %vm2184_vm10, %v2653_v42, %v2139_v35 }
 0x248   : > { %2679 = vst [vmem:[%s3855_s14 + $0x208] sm:$0xff] %v2192_v34  ;;  %2680 = vst [vmem:[%s3855_s14 + $0x210] sm:$0xff] %v2193_v55 }
 0x249   : > { %v2168_v43 = vpop.permute.xlu0 %2167  ;;  %v2171_v24 = vpop.permute.xlu1 %2170 }
 0x24a   : > { %vm2185_vm11 = vcmp.eq.s32.totalorder %v2168_v43, 1  ;;  %vm2186_vm12 = vcmp.eq.s32.totalorder %v2171_v24, 1 }
 0x24b   : > { %v2194_v61 = vsel %vm2185_vm11, %v2654_v60, %v2140_v21  ;;  %v2195_v13 = vsel %vm2186_vm12, %v2655_v23, %v2141_v48 }
 0x24c   : > { %2681 = vst [vmem:[%s3855_s14 + $0x218] sm:$0xff] %v2194_v61  ;;  %2682 = vst [vmem:[%s3855_s14 + $0x220] sm:$0xff] %v2195_v13 }
 0x24d   : > { %v2174_v10 = vpop.permute.xlu0 %2173  ;;  %v2177_v51 = vpop.permute.xlu1 %2176 }
 0x24e   : > { %vm2187_vm13 = vcmp.eq.s32.totalorder %v2174_v10, 1  ;;  %vm2188_vm14 = vcmp.eq.s32.totalorder %v2177_v51, 1 }
 0x24f   : > { %v2196_v57 = vsel %vm2187_vm13, %v2656_v6, %v2142_v8  ;;  %v2197_v16 = vsel %vm2188_vm14, %v2657_v45, %v2143_v17 }
 0x250   : > { %2683 = vst [vmem:[%s3855_s14 + $0x228] sm:$0xff] %v2196_v57  ;;  %2684 = vst [vmem:[%s3855_s14 + $0x230] sm:$0xff] %v2197_v16 }
 0x251   : > { %v2180_v32 = vpop.permute.xlu0 %2179 }
 0x252   : > { %vm2189_vm15 = vcmp.eq.s32.totalorder %v2180_v32, 1 }
 0x253   : > { %v2198_v29 = vsel %vm2189_vm15, %v2658_v47, %v2144_v33 }
 0x254   : > { %2685 = vst [vmem:[%s3855_s14 + $0x238] sm:$0xff] %v2198_v29 }
 0x255   : > { %2765 = shalt.err (!%p2762_p5)
}
 0x256   : > { %s2766_s27 = scalar_lea.hbm %s4352_s12, 9216  ;;  %s2770_s24 = scalar_lea.hbm %s4409_s5, 18432 }
 0x257   : > { %p2767_p6 = scmp.ne.s32.totalorder %s4352_s12, %s2766_s27  ;;  %p2771_p10 = scmp.lt.s32.totalorder %s4352_s12, %s4409_s5 }
 0x258   : > { %p2772_p11 = scmp.lt.s32.totalorder %s2770_s24, %s2766_s27 }
 0x259   : > { %p2768_p7 = pnand %p2767_p6, %p2904_p4 }
 0x25a   : > { %p2773_p12 = por %p2772_p11, %p2771_p10 }
 0x25b   : > { %p2769_p9 = pneg %p2768_p7 }
 0x25d   : > { %p2774_p13 = pnand %p2773_p12, %p2769_p9 }
 0x25f   : > { %2777 = shalt.err (!%p2774_p13)
}
 0x260   : > { %s2832_s7 = smov 128   ;;  %s2833_s10 = smov 8  }
 0x261   : > { %2692 = dma.vmem_to_hbm [thread:$0]  (%p2904_p4), %s4354_s8, 9216, %s4352_s12, %s4359_s21, %s2832_s7, %s2832_s7, %s2833_s10  }
 0x262 PF: > { %p2698_p0 = scmp.ge.s32.totalorder %s2828_s23, 2  ;;  %s2239_s11 = sand.u32 1, %s2808_s18  }
 0x263   : > { %s2240_s9 = scalar_lea.sflag [#allocation3], %s2239_s11 }
 0x264   : > { %p2695_p1 = pnand %p2698_p0, %p2911_p8 }
 0x266   : > { %p2696_p2 = pneg %p2695_p1 }
 0x268   : > { %2803 = dma.done.wait (%p2696_p2), %s2240_s9, 9216  }
 0x269   : > { %2805 = vsyncadd (%p2696_p2), %s2240_s9, 4294958080  ;;  %s18_s23 = sadd.s32 1, %s2828_s23   ;;  %s4498_s18 = smov %s2812_s19 }
 0x26a   : > { %p15_p3 = scmp.ge.s32.totalorder %s18_s23, 4   ;;  %s4499_s19 = smov %s2816_s20 }
 0x26b   : > { %s4500_s20 = smov %s2917_s6  ;;  %s4501_s21 = smov %s2824_s22 }
 0x26c   : > { %s4502_s22 = smov %s4504_s26  ;;  %17 = sbr.rel (!%p15_p3) target bundleno = 4 (0x4), region = 110 }
 0x271   :  { %2245 = vsyncpa [#allocation3], 1 }
 0x272   :  { %2247 = vsyncpa [#allocation3 + $0x1], 1 }

</bundles_post_ra>
